<compile_context>
chip_gen: v7x
topology: tpu7x:2x2x1
jax: 0.10.0
libtpu: 0.0.40
codegen_flags: <defaults>
</compile_context>

<pallas_src>
import jax
import jax.numpy as jnp
from jax.experimental import pallas as pl
from jax.experimental.pallas import tpu as pltpu


def _round_up(v, m):
    return ((v + m - 1) // m) * m


def gcn_pool_kernel(ahat_ref, x_ref, vt_ref, w1_ref, b1_ref, pooled_ref, agg_ref):
    """Grid = (row blocks, K blocks); K (aggregation) is the inner reduction axis.

    ahat_ref  : [tm, tk]    bf16 pre-normalized adjacency tile (Â = D^-1/2 A D^-1/2)
    x_ref     : [tk, Fp]    bf16 node-feature K-tile (feature dim lane-padded)
    vt_ref    : [1, tm]     f32 folded mean_nodes weights ((1/N)·1ᵀÂ) row slice
    w1_ref    : [Fp, Hp]    f32 layer-1 weight (resident);  b1_ref: [1, Hp]
    pooled_ref: [1, 1, Hp]  per-row-block partial pooled hidden vector (output)
    agg_ref   : [tm, Fp]    f32 scratch accumulator for Â_rows @ x
    """
    k = pl.program_id(1)

    @pl.when(k == 0)
    def _():
        agg_ref[...] = jnp.zeros_like(agg_ref)

    # Layer-1 aggregation (aggregation-first since F < H):
    #   agg += Â_tile @ x_tile   (bf16 inputs, f32 MXU accumulation)
    agg_ref[...] += jnp.dot(ahat_ref[...], x_ref[...],
                            preferred_element_type=jnp.float32)

    @pl.when(k == pl.num_programs(1) - 1)
    def _():
        # Layer-1 projection + bias + ReLU.
        h = jnp.dot(agg_ref[...], w1_ref[...],
                    preferred_element_type=jnp.float32) + b1_ref[...]
        h = jnp.maximum(h, 0.0)
        # Layer-2 aggregation + mean_nodes folded into a vt-weighted row sum,
        # executed on the MXU (row-layout vt) instead of VPU-mul + XLU reduce.
        pooled_ref[0] = jnp.dot(vt_ref[...], h, preferred_element_type=jnp.float32)


def gcn_forward(adj, norm, x, w1, b1, w2, b2, *,
                block_rows=512, block_cols=512, ahat_dtype=jnp.bfloat16):
    """2-layer GCN (GraphConv norm='both', bias) + ReLU + mean_nodes readout.

    adj  : [N, N] dense adjacency (A[i, j] = 1 for edge j -> i); self-loops
           assumed so in-degree >= 1 (norm = deg^-1/2 is finite).
    norm : [N, 1] in_degree ** -0.5
    x    : [N, F]; w1: [F, H]; b1: [1, H]; w2: [H, C]; b2: [1, C]
    returns [1, C]
    """
    n, f = x.shape
    h_feats = w1.shape[1]
    assert block_rows % 128 == 0 and block_cols % 128 == 0

    # Algebraic fold (exactly equivalent to norm * (A @ (norm * h))):
    #   Â = diag(norm) · A · diag(norm)
    ahat = adj.astype(jnp.float32) * norm * norm.reshape(1, n)
    # Folded mean_nodes readout (row layout -> MXU pooling in the kernel):
    #   mean_n(Â r W2 + b2) == ((1/N)·1ᵀÂ) r W2 + b2
    vt = jnp.sum(ahat, axis=0, keepdims=True) / n                       # [1, N]

    # MXU / lane-aligned zero padding.  Padded Â rows/cols, vt entries, x rows,
    # W1/b1 lanes are all zero, so the result is unchanged.
    nr = _round_up(n, block_rows)        # row (node) dim of Â / vt
    nc = _round_up(n, block_cols)        # col (aggregation-K) dim of Â / rows of x
    fp = _round_up(f, 128)               # lane-dense feature dim
    hp = _round_up(h_feats, 128)         # lane-dense hidden dim

    ahat_p = jnp.zeros((nr, nc), ahat_dtype).at[:n, :n].set(ahat.astype(ahat_dtype))
    vt_p = jnp.zeros((1, nr), jnp.float32).at[:, :n].set(vt)
    x_p = jnp.zeros((nc, fp), ahat_dtype).at[:n, :f].set(x.astype(ahat_dtype))
    w1_p = jnp.zeros((fp, hp), jnp.float32).at[:f, :h_feats].set(w1.astype(jnp.float32))
    b1_p = jnp.zeros((1, hp), jnp.float32).at[:, :h_feats].set(b1.astype(jnp.float32))

    n_row_blocks = nr // block_rows
    n_col_blocks = nc // block_cols

    partial = pl.pallas_call(
        gcn_pool_kernel,
        out_shape=jax.ShapeDtypeStruct((n_row_blocks, 1, hp), jnp.float32),
        grid_spec=pltpu.PrefetchScalarGridSpec(
            num_scalar_prefetch=0,
            grid=(n_row_blocks, n_col_blocks),
            in_specs=[
                pl.BlockSpec((block_rows, block_cols), lambda i, k: (i, k)),  # Â tile
                pl.BlockSpec((block_cols, fp), lambda i, k: (k, 0)),          # x K-tile
                pl.BlockSpec((1, block_rows), lambda i, k: (0, i)),           # vt slice
                pl.BlockSpec((fp, hp), lambda i, k: (0, 0)),                  # W1 (resident)
                pl.BlockSpec((1, hp), lambda i, k: (0, 0)),                   # b1 (resident)
            ],
            out_specs=pl.BlockSpec((1, 1, hp), lambda i, k: (i, 0, 0)),
            scratch_shapes=[pltpu.VMEM((block_rows, fp), jnp.float32)],
        ),
        compiler_params=pltpu.CompilerParams(
            # Row blocks write independent partial outputs -> "parallel"
            # (megacore-shardable on v7x); K is the reduction axis.
            dimension_semantics=("parallel", "arbitrary"),
        ),
    )(ahat_p, x_p, vt_p, w1_p, b1_p)

    # Tiny epilogue: sum per-block partial pooled vectors, then layer-2 projection.
    pooled = jnp.sum(partial[:, 0, :h_feats], axis=0, keepdims=True)    # [1, H]
    return pooled @ w2.astype(jnp.float32) + b2.astype(jnp.float32)     # [1, C]


if __name__ == "__main__":
    key = jax.random.PRNGKey(0)
    k_adj, k_x, k_w1, k_b1, k_w2, k_b2 = jax.random.split(key, 6)

    num_nodes, in_feats, h_feats, num_classes = 16, 8, 32, 4

    # Deterministic synthetic undirected graph with self-loops (degree >= 1).
    rnd = jax.random.uniform(k_adj, (num_nodes, num_nodes))
    upper = jnp.triu(jnp.where(rnd > 0.6, 1.0, 0.0), k=1)
    adj = (upper + upper.T + jnp.eye(num_nodes)).astype(jnp.float32)    # [N, N]
    deg = jnp.sum(adj, axis=1, keepdims=True)
    norm = jnp.power(deg, -0.5).astype(jnp.float32)                     # [N, 1]

    # Node features and deterministically-initialized layer parameters.
    x = jax.random.normal(k_x, (num_nodes, in_feats), dtype=jnp.float32)
    w1 = 0.1 * jax.random.normal(k_w1, (in_feats, h_feats), dtype=jnp.float32)
    b1 = 0.01 * jax.random.normal(k_b1, (1, h_feats), dtype=jnp.float32)
    w2 = 0.1 * jax.random.normal(k_w2, (h_feats, num_classes), dtype=jnp.float32)
    b2 = 0.01 * jax.random.normal(k_b2, (1, num_classes), dtype=jnp.float32)

    out = gcn_forward(adj, norm, x, w1, b1, w2, b2)
    out = jax.block_until_ready(out)
    assert out.shape == (1, num_classes)

    # Pure-JAX reference in the original (un-folded) DGL GraphConv formulation.
    def ref(adj, norm, x, w1, b1, w2, b2):
        h = jnp.dot(adj, (x * norm) @ w1,
                    preferred_element_type=jnp.float32) * norm + b1
        h = jnp.maximum(h, 0.0)
        h = jnp.dot(adj, (h * norm) @ w2,
                    preferred_element_type=jnp.float32) * norm + b2
        return jnp.mean(h, axis=0, keepdims=True)

    expected = ref(adj, norm, x, w1, b1, w2, b2)
    # bf16 Â / x with f32 accumulation -> loosened (but still tight) tolerance.
    assert jnp.allclose(out, expected, rtol=2e-2, atol=2e-3), (out, expected)
    print("KERNEL_OK")
</pallas_src>

<mosaic_0001>
module attributes {stable_mosaic.version = 11 : i64} {
  func.func @gcn_pool_kernel(%arg0: i32, %arg1: i32, %arg2: memref<512x512xbf16, #tpu.memory_space<vmem>>, %arg3: memref<512x128xbf16, #tpu.memory_space<vmem>>, %arg4: memref<1x512xf32, #tpu.memory_space<vmem>>, %arg5: memref<128x128xf32, #tpu.memory_space<vmem>>, %arg6: memref<1x128xf32, #tpu.memory_space<vmem>>, %arg7: memref<1x1x128xf32, #tpu.memory_space<vmem>>, %arg8: memref<512x128xf32, #tpu.memory_space<vmem>>) attributes {dimension_semantics = [#tpu.dimension_semantics<parallel>, #tpu.dimension_semantics<arbitrary>], iteration_bounds = array<i64: 1, 1>, scalar_prefetch = 0 : i64, scratch_operands = 1 : i64, tpu.core_type = #tpu.core_type<tc>, window_params = [{transform_indices = @transform_0, window_bounds = array<i64: 512, 512>}, {transform_indices = @transform_1, window_bounds = array<i64: 512, 128>}, {transform_indices = @transform_2, window_bounds = array<i64: 1, 512>}, {pipeline_mode = #tpu.pipeline_mode<synchronous>, transform_indices = @transform_3, window_bounds = array<i64: 128, 128>}, {pipeline_mode = #tpu.pipeline_mode<synchronous>, transform_indices = @transform_4, window_bounds = array<i64: 1, 128>}, {transform_indices = @transform_5, window_bounds = array<i64: 1, 1, 128>}]} {
    %c0_i32 = arith.constant 0 : i32
    %0 = arith.cmpi eq, %arg1, %c0_i32 : i32
    %1 = arith.extui %0 : i1 to i32
    %c0_i32_0 = arith.constant 0 : i32
    %2 = arith.cmpi ne, %1, %c0_i32_0 : i32
    scf.if %2 {
      %cst_10 = arith.constant 0.000000e+00 : f32
      %12 = vector.broadcast %cst_10 : f32 to vector<512x128xf32>
      %c0_11 = arith.constant 0 : index
      %c0_12 = arith.constant 0 : index
      %13 = vector.load %arg8[%c0_11, %c0_12] : memref<512x128xf32, #tpu.memory_space<vmem>>, vector<512x128xf32>
      tpu.vector_store %arg8[%c0_11, %c0_12], %12 {strides = array<i32>} : memref<512x128xf32, #tpu.memory_space<vmem>>, vector<512x128xf32>,
    } else {
    }
    %c0 = arith.constant 0 : index
    %c0_1 = arith.constant 0 : index
    %3 = vector.load %arg8[%c0, %c0_1] : memref<512x128xf32, #tpu.memory_space<vmem>>, vector<512x128xf32>
    %c0_2 = arith.constant 0 : index
    %c0_3 = arith.constant 0 : index
    %4 = vector.load %arg2[%c0_2, %c0_3] : memref<512x512xbf16, #tpu.memory_space<vmem>>, vector<512x512xbf16>
    %c0_4 = arith.constant 0 : index
    %c0_5 = arith.constant 0 : index
    %5 = vector.load %arg3[%c0_4, %c0_5] : memref<512x128xbf16, #tpu.memory_space<vmem>>, vector<512x128xbf16>
    %cst = arith.constant dense<0.000000e+00> : vector<512x128xf32>
    %6 = tpu.matmul %4, %5, %cst {dimension_numbers = #tpu.dot_dimension_numbers<[1], [0], [0], [1], [0, 0, 1, 1], [], []>} : vector<512x512xbf16>, vector<512x128xbf16>, vector<512x128xf32> -> vector<512x128xf32>
    %7 = arith.addf %3, %6 : vector<512x128xf32>
    %c0_6 = arith.constant 0 : index
    %c0_7 = arith.constant 0 : index
    %8 = vector.load %arg8[%c0_6, %c0_7] : memref<512x128xf32, #tpu.memory_space<vmem>>, vector<512x128xf32>
    tpu.vector_store %arg8[%c0_6, %c0_7], %7 {strides = array<i32>} : memref<512x128xf32, #tpu.memory_space<vmem>>, vector<512x128xf32>,
    %c0_i32_8 = arith.constant 0 : i32
    %9 = arith.cmpi eq, %arg1, %c0_i32_8 : i32
    %10 = arith.extui %9 : i1 to i32
    %c0_i32_9 = arith.constant 0 : i32
    %11 = arith.cmpi ne, %10, %c0_i32_9 : i32
    scf.if %11 {
      %c0_10 = arith.constant 0 : index
      %c0_11 = arith.constant 0 : index
      %12 = vector.load %arg8[%c0_10, %c0_11] : memref<512x128xf32, #tpu.memory_space<vmem>>, vector<512x128xf32>
      %c0_12 = arith.constant 0 : index
      %c0_13 = arith.constant 0 : index
      %13 = vector.load %arg5[%c0_12, %c0_13] : memref<128x128xf32, #tpu.memory_space<vmem>>, vector<128x128xf32>
      %cst_14 = arith.constant dense<0.000000e+00> : vector<512x128xf32>
      %14 = tpu.matmul %12, %13, %cst_14 {dimension_numbers = #tpu.dot_dimension_numbers<[1], [0], [0], [1], [0, 0, 1, 1], [], []>} : vector<512x128xf32>, vector<128x128xf32>, vector<512x128xf32> -> vector<512x128xf32>
      %c0_15 = arith.constant 0 : index
      %c0_16 = arith.constant 0 : index
      %15 = vector.load %arg6[%c0_15, %c0_16] : memref<1x128xf32, #tpu.memory_space<vmem>>, vector<1x128xf32>
      %16 = vector.broadcast %15 : vector<1x128xf32> to vector<512x128xf32>
      %17 = arith.addf %14, %16 : vector<512x128xf32>
      %cst_17 = arith.constant 0.000000e+00 : f32
      %18 = vector.broadcast %cst_17 : f32 to vector<512x128xf32>
      %19 = arith.maximumf %17, %18 : vector<512x128xf32>
      %c0_18 = arith.constant 0 : index
      %c0_19 = arith.constant 0 : index
      %20 = vector.load %arg4[%c0_18, %c0_19] : memref<1x512xf32, #tpu.memory_space<vmem>>, vector<1x512xf32>
      %cst_20 = arith.constant dense<0.000000e+00> : vector<1x128xf32>
      %21 = tpu.matmul %20, %19, %cst_20 {dimension_numbers = #tpu.dot_dimension_numbers<[1], [0], [0], [1], [0, 0, 1, 1], [], []>} : vector<1x512xf32>, vector<512x128xf32>, vector<1x128xf32> -> vector<1x128xf32>
      %c0_21 = arith.constant 0 : index
      %c0_22 = arith.constant 0 : index
      %c0_23 = arith.constant 0 : index
      %22 = vector.load %arg7[%c0_21, %c0_22, %c0_23] : memref<1x1x128xf32, #tpu.memory_space<vmem>>, vector<1x1x128xf32>
      %23 = vector.shape_cast %22 : vector<1x1x128xf32> to vector<1x128xf32>
      %24 = vector.shape_cast %21 : vector<1x128xf32> to vector<1x1x128xf32>
      tpu.vector_store %arg7[%c0_21, %c0_22, %c0_23], %24 {strides = array<i32>} : memref<1x1x128xf32, #tpu.memory_space<vmem>>, vector<1x1x128xf32>,
    } else {
    }
    return
  }
  func.func @transform_0(%arg0: i32, %arg1: i32) -> (i32, i32) {
    %c0_i32 = arith.constant 0 : i32
    return %arg0, %arg1 : i32, i32
  }
  func.func @transform_1(%arg0: i32, %arg1: i32) -> (i32, i32) {
    %c0_i32 = arith.constant 0 : i32
    %c0_i32_0 = arith.constant 0 : i32
    return %arg1, %c0_i32 : i32, i32
  }
  func.func @transform_2(%arg0: i32, %arg1: i32) -> (i32, i32) {
    %c0_i32 = arith.constant 0 : i32
    %c0_i32_0 = arith.constant 0 : i32
    return %c0_i32, %arg0 : i32, i32
  }
  func.func @transform_3(%arg0: i32, %arg1: i32) -> (i32, i32) {
    %c0_i32 = arith.constant 0 : i32
    %c0_i32_0 = arith.constant 0 : i32
    %c0_i32_1 = arith.constant 0 : i32
    return %c0_i32, %c0_i32_0 : i32, i32
  }
  func.func @transform_4(%arg0: i32, %arg1: i32) -> (i32, i32) {
    %c0_i32 = arith.constant 0 : i32
    %c0_i32_0 = arith.constant 0 : i32
    %c0_i32_1 = arith.constant 0 : i32
    return %c0_i32, %c0_i32_0 : i32, i32
  }
  func.func @transform_5(%arg0: i32, %arg1: i32) -> (i32, i32, i32) {
    %c0_i32 = arith.constant 0 : i32
    %c0_i32_0 = arith.constant 0 : i32
    %c0_i32_1 = arith.constant 0 : i32
    return %arg0, %c0_i32, %c0_i32_0 : i32, i32, i32
  }
}

</mosaic_0001>

<bundles_post_ra>
// kernel: tpu_custom_call.1
= control target key start
LH: loop header
LB: loop body
LE: loop exit
PB: predicated region body
PF: predicated region fallthrough
CT: control target
= control target key end

     0   :  { %10 = vsyncpa [#allocation4], 0  ;;  %s4017_s0 = inlined_call_operand.hbm [shape: bf16[512,512], index: 0, kind: input, shape index: {}]   ;;  %s4018_s1 = inlined_call_operand.hbm [shape: bf16[512,128], index: 1, kind: input, shape index: {}]   ;;  %s4019_s2 = inlined_call_operand.vmem [shape: f32[1,512], index: 2, kind: input, shape index: {}]   ;;  %s4020_s3 = inlined_call_operand.hbm [shape: f32[128,128], index: 3, kind: input, shape index: {}]   ;;  %s4021_s4 = inlined_call_operand.vmem [shape: f32[1,128], index: 4, kind: input, shape index: {}]   ;;  %s4022_s5 = inlined_call_operand.hbm [shape: f32[1,1,128], index: 5, kind: output, shape index: {}]  }
   0x1   :  { %11 = vsyncpa [#allocation7], 0 }
   0x2   :  { %12 = vsyncpa [#allocation5], 0  ;;  %s3625_s18 = smov [#allocation6]   ;;  %s3531_s22 = scalar_lea.hbm %s4018_s1, 4096 }
   0x3   :  { %s30_s19 = sshll.u32 %s3625_s18, 4  ;;  %p3532_p0 = scmp.ne.s32.totalorder %s4018_s1, %s3531_s22  ;;  %s31_s19 = int_to_ptr.vmem [resolvable:$true] %s30_s19 }
   0x4   :  { %p3535_p1 = scmp.lt.u32.totalorder %s3531_s22, %s4018_s1 }
   0x6   :  { %p3537_p2 = pnand %p3535_p1, %p3532_p0 }
   0x8   :  { %3540 = shalt.err (!%p3537_p2)
}
   0x9   :  { %s3541_s27 = scalar_lea.vmem %s31_s19, 4096  ;;  %p3546_p4 = scmp.lt.s32.totalorder %s31_s19, %s31_s19 }
   0xa   :  { %p3542_p3 = scmp.ne.s32.totalorder %s31_s19, %s3541_s27  ;;  %p3547_p5 = scmp.lt.s32.totalorder %s3541_s27, %s3541_s27 }
   0xc   :  { %p3548_p6 = por %p3547_p5, %p3546_p4 }
   0xe   :  { %p3549_p7 = pnand %p3548_p6, %p3542_p3 }
  0x10   :  { %3552 = shalt.err (!%p3549_p7)
}
  0x11   :  { %s3626_s28 = smov 64   ;;  %s3627_s29 = smov 4  }
  0x12   :  { %36 = dma.hbm_to_vmem [thread:$0]  %s4018_s1, 4096, %s31_s19, [#allocation7], %s3626_s28, %s3626_s28, %s3627_s29  }
  0x13   :  { %s3628_s7 = smov [#allocation3]   ;;  %s3553_s11 = scalar_lea.hbm %s4017_s0, 16384 }
  0x14   :  { %s18_s8 = sshll.u32 %s3628_s7, 4  ;;  %p3554_p8 = scmp.ne.s32.totalorder %s4017_s0, %s3553_s11  ;;  %s19_s8 = int_to_ptr.vmem [resolvable:$true] %s18_s8 }
  0x15   :  { %p3557_p9 = scmp.lt.u32.totalorder %s3553_s11, %s4017_s0 }
  0x17   :  { %p3559_p10 = pnand %p3557_p9, %p3554_p8 }
  0x19   :  { %3562 = shalt.err (!%p3559_p10)
}
  0x1a   :  { %s3563_s16 = scalar_lea.vmem %s19_s8, 16384  ;;  %p3568_p12 = scmp.lt.s32.totalorder %s19_s8, %s19_s8 }
  0x1b   :  { %p3564_p11 = scmp.ne.s32.totalorder %s19_s8, %s3563_s16  ;;  %p3569_p13 = scmp.lt.s32.totalorder %s3563_s16, %s3563_s16 }
  0x1d   :  { %p3570_p0 = por %p3569_p13, %p3568_p12 }
  0x1f   :  { %p3571_p1 = pnand %p3570_p0, %p3564_p11 }
  0x21   :  { %3574 = shalt.err (!%p3571_p1)
}
  0x22   :  { %s3629_s1 = smov 256   ;;  %s3630_s17 = smov 16  }
  0x23   :  { %24 = dma.hbm_to_vmem [thread:$0]  %s4017_s0, 16384, %s19_s8, [#allocation4], %s3629_s1, %s3629_s1, %s3630_s17  }
  0x24   :  { %s3631_s20 = smov [#allocation8]   ;;  %s3575_s24 = scalar_lea.hbm %s4020_s3, 2048 }
  0x25   :  { %s44_s21 = sshll.u32 %s3631_s20, 4  ;;  %p3576_p2 = scmp.ne.s32.totalorder %s4020_s3, %s3575_s24  ;;  %s45_s21 = int_to_ptr.vmem [resolvable:$true] %s44_s21 }
  0x26   :  { %p3579_p3 = scmp.lt.u32.totalorder %s3575_s24, %s4020_s3 }
  0x28   :  { %p3581_p4 = pnand %p3579_p3, %p3576_p2 }
  0x2a   :  { %3584 = shalt.err (!%p3581_p4)
}
  0x2b   :  { %s3585_s29 = scalar_lea.vmem %s45_s21, 2048  ;;  %p3590_p6 = scmp.lt.s32.totalorder %s45_s21, %s45_s21 }
  0x2c   :  { %p3586_p5 = scmp.ne.s32.totalorder %s45_s21, %s3585_s29  ;;  %p3591_p7 = scmp.lt.s32.totalorder %s3585_s29, %s3585_s29 }
  0x2e   :  { %p3592_p8 = por %p3591_p7, %p3590_p6 }
  0x30   :  { %p3593_p9 = pnand %p3592_p8, %p3586_p5 }
  0x32   :  { %3596 = shalt.err (!%p3593_p9)
}
  0x33   :  { %s3632_s0 = smov 128   ;;  %s3633_s30 = smov 8  }
  0x34   :  { %50 = dma.hbm_to_vmem [thread:$0]  %s4020_s3, 2048, %s45_s21, [#allocation7], %s3632_s0, %s3632_s0, %s3633_s30  }
  0x35   :  { %3619 = dma.done.wait [#allocation4], 16384  }
  0x36   :  { %3620 = vsyncadd [#allocation4], 4294950912 }
  0x37   :  { %3621 = dma.done.wait [#allocation7], 6144  }
  0x38   :  { %3622 = vsyncadd [#allocation7], 4294961152  ;;  %v3634_v0 = vmov 0   ;;  %v3307_v1 = vld [vmem:[#allocation6] sm:$0xff]   ;;  %v3308_v2 = vld [vmem:[#allocation6 + $0x8] sm:$0xff]  }
  0x39   :  { %1219 = vmatprep.subr.bf16.mxu0 %v3634_v0  ;;  %3178 = vmatprep.subr.bf16.mxu1 %v3634_v0  ;;  %v3309_v3 = vld [vmem:[#allocation6 + $0x10] sm:$0xff]   ;;  %v3310_v4 = vld [vmem:[#allocation6 + $0x18] sm:$0xff]   ;;  %v3311_v5 = vld [vmem:[#allocation6 + $0x20] sm:$0xff]  }
  0x3a   :  { %1220 = vmatpush1.bf16.msra.mxu0 %v3307_v1  ;;  %3194 = vmatpush1.bf16.msra.mxu1 %v3307_v1  ;;  %v3325_v6 = vld [vmem:[#allocation3 + $0x4] ss:$16 sps:$4 sm:$0xff]   ;;  %v3312_v7 = vld [vmem:[#allocation6 + $0x28] sm:$0xff]   ;;  %v3314_v9 = vld [vmem:[#allocation6 + $0x38] sm:$0xff]  }
  0x3b   :  { %1221 = vmatprep.subr.bf16.mxu0 %v3634_v0  ;;  %3179 = vmatprep.subr.bf16.mxu1 %v3634_v0  ;;  %v3313_v8 = vld [vmem:[#allocation6 + $0x30] sm:$0xff]   ;;  %v3315_v10 = vld [vmem:[#allocation6 + $0x40] sm:$0xff]   ;;  %v3316_v11 = vld [vmem:[#allocation6 + $0x48] sm:$0xff]  }
  0x3c   :  { %1251 = vmatprep.mubr.bf16.mxu0 %v3325_v6  ;;  %v3317_v12 = vld [vmem:[#allocation6 + $0x50] sm:$0xff]   ;;  %v3318_v13 = vld [vmem:[#allocation6 + $0x58] sm:$0xff]   ;;  %v3319_v14 = vld [vmem:[#allocation6 + $0x60] sm:$0xff]  }
  0x3d   :  { %v3320_v15 = vld [vmem:[#allocation6 + $0x68] sm:$0xff]   ;;  %v3321_v16 = vld [vmem:[#allocation6 + $0x70] sm:$0xff]   ;;  %v3322_v17 = vld [vmem:[#allocation6 + $0x78] sm:$0xff]  }
  0x3e   :  { %1222 = vmatpush1.bf16.msra.mxu0 %v3308_v2  ;;  %3195 = vmatpush1.bf16.msra.mxu1 %v3308_v2  ;;  %v3323_v18 = vld [vmem:[#allocation3] ss:$16 sps:$4 sm:$0xff]   ;;  %v3327_v20 = vld [vmem:[#allocation3 + $0x24] ss:$16 sps:$4 sm:$0xff]   ;;  %v3329_v23 = vld [vmem:[#allocation6 + $0x88] sm:$0xff]  }
  0x3f   :  { %1223 = vmatprep.subr.bf16.mxu0 %v3634_v0  ;;  %3180 = vmatprep.subr.bf16.mxu1 %v3634_v0  ;;  %v3326_v19 = vld [vmem:[#allocation6 + $0x80] sm:$0xff]   ;;  %v3331_v25 = vld [vmem:[#allocation6 + $0x90] sm:$0xff]   ;;  %v3335_v29 = vld [vmem:[#allocation6 + $0x98] sm:$0xff]  }
  0x40   :  { %v3390_v21 = vld [vmem:[#allocation3 + $0x160] ss:$16 sps:$4 sm:$0xff]   ;;  %v3392_v22 = vld [vmem:[#allocation3 + $0x164] ss:$16 sps:$4 sm:$0xff]   ;;  %v3340_v35 = vld [vmem:[#allocation6 + $0xa8] sm:$0xff]  }
  0x41   :  { %v3330_v24 = vld [vmem:[#allocation3 + $0x20] ss:$16 sps:$4 sm:$0xff]   ;;  %1339 = vmatprep.mubr.bf16.mxu1 %v3392_v22  ;;  %v3332_v26 = vld [vmem:[#allocation3 + $0x44] ss:$16 sps:$4 sm:$0xff]   ;;  %v3348_v41 = vld [vmem:[#allocation6 + $0xb8] sm:$0xff]  }
  0x42   :  { %1224 = vmatpush1.bf16.msra.mxu0 %v3309_v3  ;;  %3196 = vmatpush1.bf16.msra.mxu1 %v3309_v3  ;;  %v3396_v27 = vld [vmem:[#allocation3 + $0x184] ss:$16 sps:$4 sm:$0xff]   ;;  %v3398_v28 = vld [vmem:[#allocation3 + $0x180] ss:$16 sps:$4 sm:$0xff]   ;;  %v3353_v47 = vld [vmem:[#allocation6 + $0xc8] sm:$0xff]  }
  0x43   :  { %1225 = vmatprep.subr.bf16.mxu0 %v3634_v0  ;;  %3181 = vmatprep.subr.bf16.mxu1 %v3634_v0  ;;  %v3334_v30 = vld [vmem:[#allocation3 + $0x40] ss:$16 sps:$4 sm:$0xff]   ;;  %v3336_v31 = vld [vmem:[#allocation3 + $0x64] ss:$16 sps:$4 sm:$0xff]   ;;  %v3358_v53 = vld [vmem:[#allocation6 + $0xd8] sm:$0xff]  }
  0x44   :  { %v3338_v32 = vld [vmem:[#allocation6 + $0xa0] sm:$0xff]   ;;  %v3344_v38 = vld [vmem:[#allocation6 + $0xb0] sm:$0xff]   ;;  %v3366_v59 = vld [vmem:[#allocation6 + $0xe8] sm:$0xff]  }
  0x45   :  { %v3402_v33 = vld [vmem:[#allocation3 + $0x1a4] ss:$16 sps:$4 sm:$0xff]   ;;  %v3404_v34 = vld [vmem:[#allocation3 + $0x1a0] ss:$16 sps:$4 sm:$0xff]   ;;  %v3371_v2 = vld [vmem:[#allocation6 + $0xf8] sm:$0xff]  }
  0x46   :  { %1226 = vmatpush1.bf16.msra.mxu0 %v3310_v4  ;;  %3197 = vmatpush1.bf16.msra.mxu1 %v3310_v4  ;;  %v3339_v36 = vld [vmem:[#allocation3 + $0x60] ss:$16 sps:$4 sm:$0xff]   ;;  %v3341_v37 = vld [vmem:[#allocation3 + $0x84] ss:$16 sps:$4 sm:$0xff]   ;;  %v3380_v22 = vld [vmem:[#allocation3 + $0x48] ss:$16 sps:$4 sm:$0xff]  }
  0x47   :  { %1227 = vmatprep.subr.bf16.mxu0 %v3634_v0  ;;  %3182 = vmatprep.subr.bf16.mxu1 %v3634_v0  ;;  %v3408_v39 = vld [vmem:[#allocation3 + $0x1c4] ss:$16 sps:$4 sm:$0xff]   ;;  %v3410_v40 = vld [vmem:[#allocation3 + $0x1c0] ss:$16 sps:$4 sm:$0xff]  }
  0x48   :  { %v3343_v42 = vld [vmem:[#allocation3 + $0x80] ss:$16 sps:$4 sm:$0xff]   ;;  %v3345_v43 = vld [vmem:[#allocation3 + $0xa4] ss:$16 sps:$4 sm:$0xff]  }
  0x49   :  { %v3349_v44 = vld [vmem:[#allocation6 + $0xc0] sm:$0xff]   ;;  %v3357_v50 = vld [vmem:[#allocation6 + $0xd0] sm:$0xff]  }
  0x4a   :  { %1228 = vmatpush1.bf16.msra.mxu0 %v3311_v5  ;;  %3198 = vmatpush1.bf16.msra.mxu1 %v3311_v5  ;;  %v3414_v45 = vld [vmem:[#allocation3 + $0x1e4] ss:$16 sps:$4 sm:$0xff]   ;;  %v3416_v46 = vld [vmem:[#allocation3 + $0x1e0] ss:$16 sps:$4 sm:$0xff]  }
  0x4b   :  { %1229 = vmatprep.subr.bf16.mxu0 %v3634_v0  ;;  %3183 = vmatprep.subr.bf16.mxu1 %v3634_v0  ;;  %v3347_v48 = vld [vmem:[#allocation3 + $0xa0] ss:$16 sps:$4 sm:$0xff]   ;;  %v3350_v49 = vld [vmem:[#allocation3 + $0xc4] ss:$16 sps:$4 sm:$0xff]  }
  0x4c   :  { %v3420_v51 = vld [vmem:[#allocation3 + $0x204] ss:$16 sps:$4 sm:$0xff]   ;;  %v3422_v52 = vld [vmem:[#allocation3 + $0x200] ss:$16 sps:$4 sm:$0xff]  }
  0x4d   :  { %v3352_v54 = vld [vmem:[#allocation3 + $0xc0] ss:$16 sps:$4 sm:$0xff]   ;;  %v3354_v55 = vld [vmem:[#allocation3 + $0xe4] ss:$16 sps:$4 sm:$0xff]  }
  0x4e   :  { %1230 = vmatpush1.bf16.msra.mxu0 %v3312_v7  ;;  %3199 = vmatpush1.bf16.msra.mxu1 %v3312_v7  ;;  %v3362_v56 = vld [vmem:[#allocation6 + $0xe0] sm:$0xff]   ;;  %v3367_v62 = vld [vmem:[#allocation6 + $0xf0] sm:$0xff]  }
  0x4f   :  { %1231 = vmatprep.subr.bf16.mxu0 %v3634_v0  ;;  %3184 = vmatprep.subr.bf16.mxu1 %v3634_v0  ;;  %v3426_v57 = vld [vmem:[#allocation3 + $0x224] ss:$16 sps:$4 sm:$0xff]   ;;  %v3428_v58 = vld [vmem:[#allocation3 + $0x220] ss:$16 sps:$4 sm:$0xff]  }
  0x50   :  { %v3356_v60 = vld [vmem:[#allocation3 + $0xe0] ss:$16 sps:$4 sm:$0xff]   ;;  %v3359_v61 = vld [vmem:[#allocation3 + $0x104] ss:$16 sps:$4 sm:$0xff]  }
  0x51   :  { %v3432_v63 = vld [vmem:[#allocation3 + $0x244] ss:$16 sps:$4 sm:$0xff]   ;;  %v3434_v1 = vld [vmem:[#allocation3 + $0x240] ss:$16 sps:$4 sm:$0xff]  }
  0x52   :  { %1232 = vmatpush1.bf16.msra.mxu0 %v3313_v8  ;;  %3200 = vmatpush1.bf16.msra.mxu1 %v3313_v8  ;;  %v3361_v3 = vld [vmem:[#allocation3 + $0x100] ss:$16 sps:$4 sm:$0xff]   ;;  %v3363_v4 = vld [vmem:[#allocation3 + $0x124] ss:$16 sps:$4 sm:$0xff]  }
  0x53   :  { %1233 = vmatprep.subr.bf16.mxu0 %v3634_v0  ;;  %3185 = vmatprep.subr.bf16.mxu1 %v3634_v0  ;;  %v3438_v5 = vld [vmem:[#allocation3 + $0x264] ss:$16 sps:$4 sm:$0xff]   ;;  %v3440_v6 = vld [vmem:[#allocation3 + $0x260] ss:$16 sps:$4 sm:$0xff]  }
  0x54   :  { %v3365_v7 = vld [vmem:[#allocation3 + $0x120] ss:$16 sps:$4 sm:$0xff]   ;;  %v3368_v8 = vld [vmem:[#allocation3 + $0x144] ss:$16 sps:$4 sm:$0xff]  }
  0x56   :  { %1234 = vmatpush1.bf16.msra.mxu0 %v3314_v9  ;;  %3201 = vmatpush1.bf16.msra.mxu1 %v3314_v9  ;;  %v3444_v9 = vld [vmem:[#allocation3 + $0x284] ss:$16 sps:$4 sm:$0xff]  }
  0x57   :  { %1235 = vmatprep.subr.bf16.mxu0 %v3634_v0  ;;  %3186 = vmatprep.subr.bf16.mxu1 %v3634_v0 }
  0x5a   :  { %1236 = vmatpush1.bf16.msra.mxu0 %v3315_v10  ;;  %3202 = vmatpush1.bf16.msra.mxu1 %v3315_v10  ;;  %v3446_v10 = vld [vmem:[#allocation3 + $0x280] ss:$16 sps:$4 sm:$0xff]  }
  0x5b   :  { %1237 = vmatprep.subr.bf16.mxu0 %v3634_v0  ;;  %3187 = vmatprep.subr.bf16.mxu1 %v3634_v0 }
  0x5e   :  { %1238 = vmatpush1.bf16.msra.mxu0 %v3316_v11  ;;  %3203 = vmatpush1.bf16.msra.mxu1 %v3316_v11  ;;  %v3374_v11 = vld [vmem:[#allocation3 + $0xc] ss:$16 sps:$4 sm:$0xff]  }
  0x5f   :  { %1239 = vmatprep.subr.bf16.mxu0 %v3634_v0  ;;  %3188 = vmatprep.subr.bf16.mxu1 %v3634_v0 }
  0x62   :  { %1240 = vmatpush1.bf16.msra.mxu0 %v3317_v12  ;;  %3204 = vmatpush1.bf16.msra.mxu1 %v3317_v12  ;;  %v3450_v12 = vld [vmem:[#allocation3 + $0x2a4] ss:$16 sps:$4 sm:$0xff]  }
  0x63   :  { %1241 = vmatprep.subr.bf16.mxu0 %v3634_v0  ;;  %3189 = vmatprep.subr.bf16.mxu1 %v3634_v0 }
  0x66   :  { %1242 = vmatpush1.bf16.msra.mxu0 %v3318_v13  ;;  %3205 = vmatpush1.bf16.msra.mxu1 %v3318_v13  ;;  %v3452_v13 = vld [vmem:[#allocation3 + $0x2a0] ss:$16 sps:$4 sm:$0xff]  }
  0x67   :  { %1243 = vmatprep.subr.bf16.mxu0 %v3634_v0  ;;  %3190 = vmatprep.subr.bf16.mxu1 %v3634_v0 }
  0x6a   :  { %1244 = vmatpush1.bf16.msra.mxu0 %v3319_v14  ;;  %3206 = vmatpush1.bf16.msra.mxu1 %v3319_v14  ;;  %v3372_v14 = vld [vmem:[#allocation3 + $0x8] ss:$16 sps:$4 sm:$0xff]  }
  0x6b   :  { %1245 = vmatprep.subr.bf16.mxu0 %v3634_v0  ;;  %3191 = vmatprep.subr.bf16.mxu1 %v3634_v0 }
  0x6e   :  { %1246 = vmatpush1.bf16.msra.mxu0 %v3320_v15  ;;  %3207 = vmatpush1.bf16.msra.mxu1 %v3320_v15  ;;  %v3375_v15 = vld [vmem:[#allocation3 + $0x2c] ss:$16 sps:$4 sm:$0xff]  }
  0x6f   :  { %1247 = vmatprep.subr.bf16.mxu0 %v3634_v0  ;;  %3192 = vmatprep.subr.bf16.mxu1 %v3634_v0 }
  0x72   :  { %1248 = vmatpush1.bf16.msra.mxu0 %v3321_v16  ;;  %3208 = vmatpush1.bf16.msra.mxu1 %v3321_v16  ;;  %v3456_v16 = vld [vmem:[#allocation3 + $0x2c4] ss:$16 sps:$4 sm:$0xff]  }
  0x73   :  { %1249 = vmatprep.subr.bf16.mxu0 %v3634_v0  ;;  %3193 = vmatprep.subr.bf16.mxu1 %v3634_v0 }
  0x76   :  { %1250 = vmatpush1.bf16.msra.mxu0 %v3322_v17  ;;  %3209 = vmatpush1.bf16.msra.mxu1 %v3322_v17  ;;  %v3458_v17 = vld [vmem:[#allocation3 + $0x2c0] ss:$16 sps:$4 sm:$0xff]  }
  0x77   :  { %1508 = vmatprep.subr.bf16.mxu0 %v3634_v0 }
  0x79   :  { %1252 = vmatmul.mubr.bf16.vlgmr.msra.gmra.mrb[0].mxu0 %v3323_v18  ;;  %1340 = vmatmul.mubr.bf16.vlgmr.msra.gmra.mrb[0].mxu1 %v3390_v21  ;;  %v3377_v18 = vld [vmem:[#allocation3 + $0x28] ss:$16 sps:$4 sm:$0xff]   ;;  %v3464_v21 = vld [vmem:[#allocation3 + $0x2e0] ss:$16 sps:$4 sm:$0xff]  }
  0x7a   :  { %1509 = vmatpush1.bf16.msra.mxu0 %v3326_v19  ;;  %1259 = vmatprep.mubr.bf16.mxu0 %v3327_v20  ;;  %v3378_v19 = vld [vmem:[#allocation3 + $0x4c] ss:$16 sps:$4 sm:$0xff]   ;;  %v3462_v20 = vld [vmem:[#allocation3 + $0x2e4] ss:$16 sps:$4 sm:$0xff]  }
  0x7b   :  { %1510 = vmatprep.subr.bf16.mxu0 %v3634_v0  ;;  %1347 = vmatprep.mubr.bf16.mxu1 %v3396_v27  ;;  %v3384_v27 = vld [vmem:[#allocation3 + $0x8c] ss:$16 sps:$4 sm:$0xff]  }
  0x7e   :  { %1511 = vmatpush1.bf16.msra.mxu0 %v3329_v23  ;;  %v3381_v23 = vld [vmem:[#allocation3 + $0x6c] ss:$16 sps:$4 sm:$0xff]  }
  0x7f   :  { %1512 = vmatprep.subr.bf16.mxu0 %v3634_v0 }
  0x81   :  { %1260 = vmatmul.mubr.bf16.gmra.mrb[4].mxu0 %v3330_v24  ;;  %1348 = vmatmul.mubr.bf16.gmra.mrb[4].mxu1 %v3398_v28  ;;  %v3468_v24 = vld [vmem:[#allocation3 + $0x304] ss:$16 sps:$4 sm:$0xff]  }
  0x82   :  { %1513 = vmatpush1.bf16.msra.mxu0 %v3331_v25  ;;  %1267 = vmatprep.mubr.bf16.mxu0 %v3332_v26  ;;  %v3470_v25 = vld [vmem:[#allocation3 + $0x300] ss:$16 sps:$4 sm:$0xff]   ;;  %v3383_v26 = vld [vmem:[#allocation3 + $0x68] ss:$16 sps:$4 sm:$0xff]   ;;  %v3474_v28 = vld [vmem:[#allocation3 + $0x324] ss:$16 sps:$4 sm:$0xff]  }
  0x83   :  { %1514 = vmatprep.subr.bf16.mxu0 %v3634_v0  ;;  %1355 = vmatprep.mubr.bf16.mxu1 %v3402_v33  ;;  %v3482_v33 = vld [vmem:[#allocation3 + $0x340] ss:$16 sps:$4 sm:$0xff]  }
  0x86   :  { %1515 = vmatpush1.bf16.msra.mxu0 %v3335_v29  ;;  %v3476_v29 = vld [vmem:[#allocation3 + $0x320] ss:$16 sps:$4 sm:$0xff]  }
  0x87   :  { %1516 = vmatprep.subr.bf16.mxu0 %v3634_v0 }
  0x89   :  { %1268 = vmatmul.mubr.bf16.gmra.mrb[8].mxu0 %v3334_v30  ;;  %1356 = vmatmul.mubr.bf16.gmra.mrb[8].mxu1 %v3404_v34  ;;  %v3386_v30 = vld [vmem:[#allocation3 + $0x88] ss:$16 sps:$4 sm:$0xff]  }
  0x8a   :  { %1275 = vmatprep.mubr.bf16.mxu0 %v3336_v31  ;;  %1517 = vmatpush1.bf16.msra.mxu0 %v3338_v32  ;;  %v3387_v31 = vld [vmem:[#allocation3 + $0xac] ss:$16 sps:$4 sm:$0xff]   ;;  %v3480_v32 = vld [vmem:[#allocation3 + $0x344] ss:$16 sps:$4 sm:$0xff]   ;;  %v3389_v34 = vld [vmem:[#allocation3 + $0xa8] ss:$16 sps:$4 sm:$0xff]  }
  0x8b   :  { %1518 = vmatprep.subr.bf16.mxu0 %v3634_v0  ;;  %1363 = vmatprep.mubr.bf16.mxu1 %v3408_v39 }
  0x8e   :  { %1519 = vmatpush1.bf16.msra.mxu0 %v3340_v35  ;;  %v3393_v35 = vld [vmem:[#allocation3 + $0xcc] ss:$16 sps:$4 sm:$0xff]  }
  0x8f   :  { %1520 = vmatprep.subr.bf16.mxu0 %v3634_v0 }
  0x91   :  { %1276 = vmatmul.mubr.bf16.gmra.mrb[12].mxu0 %v3339_v36  ;;  %1364 = vmatmul.mubr.bf16.gmra.mrb[12].mxu1 %v3410_v40  ;;  %v1992_v36 = vld [vmem:[#allocation8] sm:$0xff] }
  0x92   :  { %1283 = vmatprep.mubr.bf16.mxu0 %v3341_v37  ;;  %1521 = vmatpush1.bf16.msra.mxu0 %v3344_v38  ;;  %v1993_v37 = vld [vmem:[#allocation8 + $0x8] sm:$0xff]  ;;  %v3486_v38 = vld [vmem:[#allocation3 + $0x364] ss:$16 sps:$4 sm:$0xff]   ;;  %v3488_v40 = vld [vmem:[#allocation3 + $0x360] ss:$16 sps:$4 sm:$0xff]  }
  0x93   :  { %1522 = vmatprep.subr.bf16.mxu0 %v3634_v0  ;;  %1371 = vmatprep.mubr.bf16.mxu1 %v3414_v45  ;;  %v3082_v39 = vpack.c.bf16 %v1993_v37, %v1992_v36  ;;  %v3401_v45 = vld [vmem:[#allocation3 + $0xe8] ss:$16 sps:$4 sm:$0xff]   ;;  %v3489_v37 = vld [vmem:[#allocation3 + $0x2cc] ss:$16 sps:$4 sm:$0xff]  }
  0x94   :  { %v3485_v36 = vld [vmem:[#allocation3 + $0x2a8] ss:$16 sps:$4 sm:$0xff]  }
  0x95   :  { %3083 = vmatprep.subr.bf16.mxu1 %v3082_v39 }
  0x96   :  { %1523 = vmatpush1.bf16.msra.mxu0 %v3348_v41  ;;  %v3395_v41 = vld [vmem:[#allocation3 + $0xc8] ss:$16 sps:$4 sm:$0xff]   ;;  %3085 = vmatpush3.bf16.msra.mxu1 %v3082_v39 }
  0x97   :  { %1524 = vmatprep.subr.bf16.mxu0 %v3634_v0 }
  0x99   :  { %1284 = vmatmul.mubr.bf16.gmra.mrb[16].mxu0 %v3343_v42  ;;  %1372 = vmatmul.mubr.bf16.gmra.mrb[16].mxu1 %v3416_v46  ;;  %v3399_v42 = vld [vmem:[#allocation3 + $0xec] ss:$16 sps:$4 sm:$0xff]  }
  0x9a   :  { %1291 = vmatprep.mubr.bf16.mxu0 %v3345_v43  ;;  %1525 = vmatpush1.bf16.msra.mxu0 %v3349_v44  ;;  %v3492_v43 = vld [vmem:[#allocation3 + $0x384] ss:$16 sps:$4 sm:$0xff]   ;;  %v3494_v44 = vld [vmem:[#allocation3 + $0x380] ss:$16 sps:$4 sm:$0xff]   ;;  %v3405_v46 = vld [vmem:[#allocation3 + $0x10c] ss:$16 sps:$4 sm:$0xff]  }
  0x9b   :  { %1526 = vmatprep.subr.bf16.mxu0 %v3634_v0  ;;  %1379 = vmatprep.mubr.bf16.mxu1 %v3420_v51  ;;  %v3500_v51 = vld [vmem:[#allocation3 + $0x3a0] ss:$16 sps:$4 sm:$0xff]  }
  0x9e   :  { %1527 = vmatpush1.bf16.msra.mxu0 %v3353_v47  ;;  %v1994_v47 = vld [vmem:[#allocation8 + $0x10] sm:$0xff] }
  0x9f   :  { %1528 = vmatprep.subr.bf16.mxu0 %v3634_v0 }
  0xa1   :  { %1292 = vmatmul.mubr.bf16.gmra.mrb[20].mxu0 %v3347_v48  ;;  %1380 = vmatmul.mubr.bf16.gmra.mrb[20].mxu1 %v3422_v52  ;;  %v1995_v48 = vld [vmem:[#allocation8 + $0x18] sm:$0xff]  ;;  %v1996_v52 = vld [vmem:[#allocation8 + $0x20] sm:$0xff] }
  0xa2   :  { %1299 = vmatprep.mubr.bf16.mxu0 %v3350_v49  ;;  %1529 = vmatpush1.bf16.msra.mxu0 %v3357_v50  ;;  %v3086_v49 = vpack.c.bf16 %v1995_v48, %v1994_v47  ;;  %v3498_v50 = vld [vmem:[#allocation3 + $0x3a4] ss:$16 sps:$4 sm:$0xff]   ;;  %v3497_v48 = vld [vmem:[#allocation3 + $0x2e8] ss:$16 sps:$4 sm:$0xff]  }
  0xa3   :  { %1530 = vmatprep.subr.bf16.mxu0 %v3634_v0  ;;  %1387 = vmatprep.mubr.bf16.mxu1 %v3426_v57  ;;  %v1998_v57 = vld [vmem:[#allocation8 + $0x30] sm:$0xff] }
  0xa4   :  { %3087 = vmatprep.subr.bf16.mxu1 %v3086_v49 }
  0xa5   :  { %3089 = vmatpush3.bf16.msra.mxu1 %v3086_v49  ;;  %v3501_v49 = vld [vmem:[#allocation3 + $0x30c] ss:$16 sps:$4 sm:$0xff]  }
  0xa6   :  { %1531 = vmatpush1.bf16.msra.mxu0 %v3358_v53  ;;  %v1997_v53 = vld [vmem:[#allocation8 + $0x28] sm:$0xff] }
  0xa7   :  { %1532 = vmatprep.subr.bf16.mxu0 %v3634_v0 }
  0xa9   :  { %1300 = vmatmul.mubr.bf16.gmra.mrb[24].mxu0 %v3352_v54  ;;  %1388 = vmatmul.mubr.bf16.gmra.mrb[24].mxu1 %v3428_v58  ;;  %v3090_v54 = vpack.c.bf16 %v1997_v53, %v1996_v52  ;;  %v1999_v58 = vld [vmem:[#allocation8 + $0x38] sm:$0xff] }
  0xaa   :  { %1307 = vmatprep.mubr.bf16.mxu0 %v3354_v55  ;;  %1533 = vmatpush1.bf16.msra.mxu0 %v3362_v56  ;;  %v3407_v55 = vld [vmem:[#allocation3 + $0x108] ss:$16 sps:$4 sm:$0xff]   ;;  %v3411_v56 = vld [vmem:[#allocation3 + $0x12c] ss:$16 sps:$4 sm:$0xff]  }
  0xab   :  { %1534 = vmatprep.subr.bf16.mxu0 %v3634_v0  ;;  %1395 = vmatprep.mubr.bf16.mxu1 %v3432_v63  ;;  %v2001_v63 = vld [vmem:[#allocation8 + $0x48] sm:$0xff] }
  0xac   :  { %3091 = vmatprep.subr.bf16.mxu1 %v3090_v54 }
  0xad   :  { %3093 = vmatpush3.bf16.msra.mxu1 %v3090_v54  ;;  %v3503_v54 = vld [vmem:[#allocation3 + $0x308] ss:$16 sps:$4 sm:$0xff]  }
  0xae   :  { %1535 = vmatpush1.bf16.msra.mxu0 %v3366_v59  ;;  %v3094_v59 = vpack.c.bf16 %v1999_v58, %v1998_v57 }
  0xaf   :  { %1536 = vmatprep.subr.bf16.mxu0 %v3634_v0 }
  0xb0   :  { %3095 = vmatprep.subr.bf16.mxu1 %v3094_v59 }
  0xb1   :  { %1308 = vmatmul.mubr.bf16.gmra.mrb[28].mxu0 %v3356_v60  ;;  %1396 = vmatmul.mubr.bf16.gmra.mrb[28].mxu1 %v3434_v1  ;;  %v3504_v60 = vld [vmem:[#allocation3 + $0x3c4] ss:$16 sps:$4 sm:$0xff]  }
  0xb2   :  { %1315 = vmatprep.mubr.bf16.mxu0 %v3359_v61  ;;  %1537 = vmatpush1.bf16.msra.mxu0 %v3367_v62  ;;  %v3506_v61 = vld [vmem:[#allocation3 + $0x3c0] ss:$16 sps:$4 sm:$0xff]  }
  0xb3   :  { %1538 = vmatprep.subr.bf16.mxu0 %v3634_v0  ;;  %1403 = vmatprep.mubr.bf16.mxu1 %v3438_v5  ;;  %v3370_v0 = vld [vmem:[#allocation3 + $0x140] ss:$16 sps:$4 sm:$0xff]   ;;  %v2003_v5 = vld [vmem:[#allocation8 + $0x58] sm:$0xff] }
  0xb4   :  { %v2000_v62 = vld [vmem:[#allocation8 + $0x40] sm:$0xff]  ;;  %3097 = vmatpush3.bf16.msra.mxu1 %v3094_v59 }
  0xb5   :  { %v3098_v1 = vpack.c.bf16 %v2001_v63, %v2000_v62 }
  0xb6   :  { %1539 = vmatpush1.bf16.msra.mxu0 %v3371_v2  ;;  %v3413_v2 = vld [vmem:[#allocation3 + $0x128] ss:$16 sps:$4 sm:$0xff]  }
  0xb7   :  { %3099 = vmatprep.subr.bf16.mxu1 %v3098_v1 }
  0xb8   :  { %3101 = vmatpush3.bf16.msra.mxu1 %v3098_v1 }
  0xb9   :  { %1316 = vmatmul.mubr.bf16.gmra.mrb[32].mxu0 %v3361_v3  ;;  %1404 = vmatmul.mubr.bf16.gmra.mrb[32].mxu1 %v3440_v6  ;;  %v3417_v3 = vld [vmem:[#allocation3 + $0x14c] ss:$16 sps:$4 sm:$0xff]  }
  0xba   :  { %1323 = vmatprep.mubr.bf16.mxu0 %v3363_v4  ;;  %1411 = vmatprep.mubr.bf16.mxu1 %v3444_v9  ;;  %v2002_v4 = vld [vmem:[#allocation8 + $0x50] sm:$0xff]  ;;  %v2004_v9 = vld [vmem:[#allocation8 + $0x60] sm:$0xff] }
  0xbb   :  { %v3102_v6 = vpack.c.bf16 %v2003_v5, %v2002_v4  ;;  %v3516_v4 = vld [vmem:[#allocation3 + $0x36c] ss:$16 sps:$4 sm:$0xff]  }
  0xbd   :  { %3103 = vmatprep.subr.bf16.mxu1 %v3102_v6 }
  0xbe   :  { %3105 = vmatpush3.bf16.msra.mxu1 %v3102_v6 }
  0xc1   :  { %1324 = vmatmul.mubr.bf16.gmra.mrb[36].mxu0 %v3365_v7  ;;  %1412 = vmatmul.mubr.bf16.gmra.mrb[36].mxu1 %v3446_v10  ;;  %v3510_v7 = vld [vmem:[#allocation3 + $0x3e4] ss:$16 sps:$4 sm:$0xff]   ;;  %v2005_v10 = vld [vmem:[#allocation8 + $0x68] sm:$0xff] }
  0xc2   :  { %1331 = vmatprep.mubr.bf16.mxu0 %v3368_v8  ;;  %1419 = vmatprep.mubr.bf16.mxu1 %v3450_v12  ;;  %v3512_v8 = vld [vmem:[#allocation3 + $0x3e0] ss:$16 sps:$4 sm:$0xff]   ;;  %v3423_v12 = vld [vmem:[#allocation3 + $0x16c] ss:$16 sps:$4 sm:$0xff]  }
  0xc9   :  { %1332 = vmatmul.mubr.bf16.gmra.mrb[40].mxu0 %v3370_v0  ;;  %1420 = vmatmul.mubr.bf16.gmra.mrb[40].mxu1 %v3452_v13  ;;  %v3106_v0 = vpack.c.bf16 %v2005_v10, %v2004_v9  ;;  %v2006_v13 = vld [vmem:[#allocation8 + $0x70] sm:$0xff] }
  0xca   :  { %1540 = vmatprep.mubr.bf16.mxu0 %v3374_v11  ;;  %1427 = vmatprep.mubr.bf16.mxu1 %v3456_v16  ;;  %v3419_v11 = vld [vmem:[#allocation3 + $0x148] ss:$16 sps:$4 sm:$0xff]  }
  0xcb   :  { %3107 = vmatprep.subr.bf16.mxu1 %v3106_v0  ;;  %v3425_v16 = vld [vmem:[#allocation3 + $0x168] ss:$16 sps:$4 sm:$0xff]  }
  0xcc   :  { %3109 = vmatpush3.bf16.msra.mxu1 %v3106_v0  ;;  %v3518_v0 = vld [vmem:[#allocation3 + $0x368] ss:$16 sps:$4 sm:$0xff]  }
  0xd1   :  { %1541 = vmatmul.mubr.bf16.vlgmr.msra.gmra.mrb[0].mxu0 %v3372_v14  ;;  %1428 = vmatmul.mubr.bf16.gmra.mrb[44].mxu1 %v3458_v17  ;;  %v2007_v14 = vld [vmem:[#allocation8 + $0x78] sm:$0xff] }
  0xd2   :  { %1548 = vmatprep.mubr.bf16.mxu0 %v3375_v15  ;;  %1435 = vmatprep.mubr.bf16.mxu1 %v3462_v20  ;;  %v3110_v15 = vpack.c.bf16 %v2007_v14, %v2006_v13  ;;  %v3429_v17 = vld [vmem:[#allocation3 + $0x18c] ss:$16 sps:$4 sm:$0xff]   ;;  %v3437_v20 = vld [vmem:[#allocation3 + $0x1a8] ss:$16 sps:$4 sm:$0xff]  }
  0xd4   :  { %3111 = vmatprep.subr.bf16.mxu1 %v3110_v15 }
  0xd5   :  { %3113 = vmatpush3.bf16.msra.mxu1 %v3110_v15 }
  0xd9   :  { %1549 = vmatmul.mubr.bf16.gmra.mrb[4].mxu0 %v3377_v18  ;;  %1436 = vmatmul.mubr.bf16.gmra.mrb[48].mxu1 %v3464_v21  ;;  %v3431_v18 = vld [vmem:[#allocation3 + $0x188] ss:$16 sps:$4 sm:$0xff]   ;;  %v3441_v21 = vld [vmem:[#allocation3 + $0x1cc] ss:$16 sps:$4 sm:$0xff]  }
  0xda   :  { %1556 = vmatprep.mubr.bf16.mxu0 %v3378_v19  ;;  %1443 = vmatprep.mubr.bf16.mxu1 %v3468_v24  ;;  %v3435_v19 = vld [vmem:[#allocation3 + $0x1ac] ss:$16 sps:$4 sm:$0xff]   ;;  %v3449_v24 = vld [vmem:[#allocation3 + $0x1e8] ss:$16 sps:$4 sm:$0xff]  }
  0xe1   :  { %1557 = vmatmul.mubr.bf16.gmra.mrb[8].mxu0 %v3380_v22  ;;  %1444 = vmatmul.mubr.bf16.gmra.mrb[52].mxu1 %v3470_v25  ;;  %v3443_v22 = vld [vmem:[#allocation3 + $0x1c8] ss:$16 sps:$4 sm:$0xff]   ;;  %v3453_v25 = vld [vmem:[#allocation3 + $0x20c] ss:$16 sps:$4 sm:$0xff]  }
  0xe2   :  { %1564 = vmatprep.mubr.bf16.mxu0 %v3381_v23  ;;  %1451 = vmatprep.mubr.bf16.mxu1 %v3474_v28  ;;  %v3447_v23 = vld [vmem:[#allocation3 + $0x1ec] ss:$16 sps:$4 sm:$0xff]   ;;  %v3461_v28 = vld [vmem:[#allocation3 + $0x228] ss:$16 sps:$4 sm:$0xff]  }
  0xe9   :  { %1565 = vmatmul.mubr.bf16.gmra.mrb[12].mxu0 %v3383_v26  ;;  %1452 = vmatmul.mubr.bf16.gmra.mrb[56].mxu1 %v3476_v29  ;;  %v3455_v26 = vld [vmem:[#allocation3 + $0x208] ss:$16 sps:$4 sm:$0xff]   ;;  %v3465_v29 = vld [vmem:[#allocation3 + $0x24c] ss:$16 sps:$4 sm:$0xff]  }
  0xea   :  { %1572 = vmatprep.mubr.bf16.mxu0 %v3384_v27  ;;  %1459 = vmatprep.mubr.bf16.mxu1 %v3480_v32  ;;  %v3459_v27 = vld [vmem:[#allocation3 + $0x22c] ss:$16 sps:$4 sm:$0xff]   ;;  %v3473_v32 = vld [vmem:[#allocation3 + $0x268] ss:$16 sps:$4 sm:$0xff]  }
  0xf1   :  { %1573 = vmatmul.mubr.bf16.gmra.mrb[16].mxu0 %v3386_v30  ;;  %1460 = vmatmul.mubr.bf16.gmra.mrb[60].mxu1 %v3482_v33  ;;  %v3467_v30 = vld [vmem:[#allocation3 + $0x248] ss:$16 sps:$4 sm:$0xff]   ;;  %v3477_v33 = vld [vmem:[#allocation3 + $0x28c] ss:$16 sps:$4 sm:$0xff]  }
  0xf2   :  { %1580 = vmatprep.mubr.bf16.mxu0 %v3387_v31  ;;  %1467 = vmatprep.mubr.bf16.mxu1 %v3486_v38  ;;  %v3471_v31 = vld [vmem:[#allocation3 + $0x26c] ss:$16 sps:$4 sm:$0xff]  }
  0xf9   :  { %1581 = vmatmul.mubr.bf16.gmra.mrb[20].mxu0 %v3389_v34  ;;  %1468 = vmatmul.mubr.bf16.gmra.mrb[64].mxu1 %v3488_v40  ;;  %v3479_v34 = vld [vmem:[#allocation3 + $0x288] ss:$16 sps:$4 sm:$0xff]  }
  0xfa   :  { %1588 = vmatprep.mubr.bf16.mxu0 %v3393_v35  ;;  %1475 = vmatprep.mubr.bf16.mxu1 %v3492_v43  ;;  %v3483_v35 = vld [vmem:[#allocation3 + $0x2ac] ss:$16 sps:$4 sm:$0xff]  }
  0xfb   :  { %v3495_v43 = vld [vmem:[#allocation3 + $0x2ec] ss:$16 sps:$4 sm:$0xff]  }
 0x101   :  { %1589 = vmatmul.mubr.bf16.gmra.mrb[24].mxu0 %v3395_v41  ;;  %1476 = vmatmul.mubr.bf16.gmra.mrb[68].mxu1 %v3494_v44 }
 0x102   :  { %1596 = vmatprep.mubr.bf16.mxu0 %v3399_v42  ;;  %1483 = vmatprep.mubr.bf16.mxu1 %v3498_v50  ;;  %v3491_v42 = vld [vmem:[#allocation3 + $0x2c8] ss:$16 sps:$4 sm:$0xff]  }
 0x109   :  { %1597 = vmatmul.mubr.bf16.gmra.mrb[28].mxu0 %v3401_v45  ;;  %1484 = vmatmul.mubr.bf16.gmra.mrb[72].mxu1 %v3500_v51 }
 0x10a   :  { %1604 = vmatprep.mubr.bf16.mxu0 %v3405_v46  ;;  %1491 = vmatprep.mubr.bf16.mxu1 %v3504_v60  ;;  %v3509_v60 = vld [vmem:[#allocation3 + $0x328] ss:$16 sps:$4 sm:$0xff]  }
 0x111   :  { %1605 = vmatmul.mubr.bf16.gmra.mrb[32].mxu0 %v3407_v55  ;;  %1492 = vmatmul.mubr.bf16.gmra.mrb[76].mxu1 %v3506_v61  ;;  %v3507_v55 = vld [vmem:[#allocation3 + $0x32c] ss:$16 sps:$4 sm:$0xff]  }
 0x112   :  { %1612 = vmatprep.mubr.bf16.mxu0 %v3411_v56  ;;  %1499 = vmatprep.mubr.bf16.mxu1 %v3510_v7  ;;  %v3513_v61 = vld [vmem:[#allocation3 + $0x34c] ss:$16 sps:$4 sm:$0xff]  }
 0x119   :  { %1613 = vmatmul.mubr.bf16.gmra.mrb[36].mxu0 %v3413_v2  ;;  %1500 = vmatmul.mubr.bf16.gmra.mrb[80].mxu1 %v3512_v8 }
 0x11a   :  { %1620 = vmatprep.mubr.bf16.mxu0 %v3417_v3  ;;  %v3515_v3 = vld [vmem:[#allocation3 + $0x348] ss:$16 sps:$4 sm:$0xff]  }
 0x121   :  { %1621 = vmatmul.mubr.bf16.gmra.mrb[40].mxu0 %v3419_v11 }
 0x122   :  { %1628 = vmatprep.mubr.bf16.mxu0 %v3423_v12  ;;  %v3519_v12 = vld [vmem:[#allocation3 + $0x38c] ss:$16 sps:$4 sm:$0xff]  }
 0x129   :  { %1629 = vmatmul.mubr.bf16.gmra.mrb[44].mxu0 %v3425_v16 }
 0x12a   :  { %1636 = vmatprep.mubr.bf16.mxu0 %v3429_v17 }
 0x131   :  { %1637 = vmatmul.mubr.bf16.gmra.mrb[48].mxu0 %v3431_v18 }
 0x132   :  { %1644 = vmatprep.mubr.bf16.mxu0 %v3435_v19 }
 0x139   :  { %1645 = vmatmul.mubr.bf16.gmra.mrb[52].mxu0 %v3437_v20  ;;  %v3521_v20 = vld [vmem:[#allocation3 + $0x388] ss:$16 sps:$4 sm:$0xff]  }
 0x13a   :  { %1652 = vmatprep.mubr.bf16.mxu0 %v3441_v21 }
 0x141   :  { %1653 = vmatmul.mubr.bf16.gmra.mrb[56].mxu0 %v3443_v22  ;;  %v3522_v22 = vld [vmem:[#allocation3 + $0x3ac] ss:$16 sps:$4 sm:$0xff]  }
 0x142   :  { %1660 = vmatprep.mubr.bf16.mxu0 %v3447_v23 }
 0x149   :  { %1661 = vmatmul.mubr.bf16.gmra.mrb[60].mxu0 %v3449_v24 }
 0x14a   :  { %1668 = vmatprep.mubr.bf16.mxu0 %v3453_v25 }
 0x14c   :  { %v3750_v38 = vpop.f32.mrb[0].mxu1 }
 0x14d   :  { %v1343_v39 = vpop.f32.mrb[1].mxu1 }
 0x14e   :  { %v3752_v40 = vpop.f32.mrb[2].mxu1 }
 0x14f   :  { %v1346_v41 = vpop.f32.mrb[3].mxu1 }
 0x151   :  { %1669 = vmatmul.mubr.bf16.gmra.mrb[64].mxu0 %v3455_v26 }
 0x152   :  { %1676 = vmatprep.mubr.bf16.mxu0 %v3459_v27 }
 0x154   :  { %v3754_v44 = vpop.f32.mrb[4].mxu1 }
 0x155   :  { %v1351_v45 = vpop.f32.mrb[5].mxu1 }
 0x156   :  { %v3756_v46 = vpop.f32.mrb[6].mxu1  ;;  %v3528_v45 = vld [vmem:[#allocation3 + $0x3ec] ss:$16 sps:$4 sm:$0xff]  }
 0x157   :  { %v1354_v47 = vpop.f32.mrb[7].mxu1 }
 0x159   :  { %1677 = vmatmul.mubr.bf16.gmra.mrb[68].mxu0 %v3461_v28 }
 0x15a   :  { %1684 = vmatprep.mubr.bf16.mxu0 %v3465_v29 }
 0x15c   :  { %v3758_v50 = vpop.f32.mrb[8].mxu1 }
 0x15d   :  { %v1359_v51 = vpop.f32.mrb[9].mxu1 }
 0x15e   :  { %v3760_v52 = vpop.f32.mrb[10].mxu1 }
 0x15f   :  { %v1362_v53 = vpop.f32.mrb[11].mxu1 }
 0x161   :  { %1685 = vmatmul.mubr.bf16.gmra.mrb[72].mxu0 %v3467_v30  ;;  %v3524_v30 = vld [vmem:[#allocation3 + $0x3a8] ss:$16 sps:$4 sm:$0xff]  }
 0x162   :  { %1692 = vmatprep.mubr.bf16.mxu0 %v3471_v31 }
 0x164   :  { %v3762_v56 = vpop.f32.mrb[12].mxu1 }
 0x165   :  { %v1367_v57 = vpop.f32.mrb[13].mxu1 }
 0x166   :  { %v3764_v58 = vpop.f32.mrb[14].mxu1  ;;  %v3530_v57 = vld [vmem:[#allocation3 + $0x3e8] ss:$16 sps:$4 sm:$0xff]  }
 0x167   :  { %v1370_v59 = vpop.f32.mrb[15].mxu1 }
 0x169   :  { %1693 = vmatmul.mubr.bf16.gmra.mrb[76].mxu0 %v3473_v32  ;;  %v3525_v32 = vld [vmem:[#allocation3 + $0x3cc] ss:$16 sps:$4 sm:$0xff]  }
 0x16a   :  { %1700 = vmatprep.mubr.bf16.mxu0 %v3477_v33 }
 0x16c   :  { %v3766_v62 = vpop.f32.mrb[16].mxu1 }
 0x16d   :  { %v1375_v63 = vpop.f32.mrb[17].mxu1 }
 0x16e   :  { %v3768_v1 = vpop.f32.mrb[18].mxu1 }
 0x16f   :  { %v1378_v2 = vpop.f32.mrb[19].mxu1 }
 0x171   :  { %1701 = vmatmul.mubr.bf16.gmra.mrb[80].mxu0 %v3479_v34 }
 0x172   :  { %1708 = vmatprep.mubr.bf16.mxu0 %v3483_v35 }
 0x174   :  { %v3770_v5 = vpop.f32.mrb[20].mxu1 }
 0x175   :  { %v1383_v6 = vpop.f32.mrb[21].mxu1 }
 0x176   :  { %v3772_v7 = vpop.f32.mrb[22].mxu1 }
 0x177   :  { %v1386_v9 = vpop.f32.mrb[23].mxu1 }
 0x179   :  { %1709 = vmatmul.mubr.bf16.gmra.mrb[84].mxu0 %v3485_v36 }
 0x17a   :  { %1716 = vmatprep.mubr.bf16.mxu0 %v3489_v37 }
 0x17c   :  { %v3774_v14 = vpop.f32.mrb[24].mxu1 }
 0x17d   :  { %v1391_v15 = vpop.f32.mrb[25].mxu1 }
 0x17e   :  { %v3776_v16 = vpop.f32.mrb[26].mxu1 }
 0x17f   :  { %v1394_v18 = vpop.f32.mrb[27].mxu1 }
 0x181   :  { %1717 = vmatmul.mubr.bf16.gmra.mrb[88].mxu0 %v3491_v42  ;;  %v3527_v42 = vld [vmem:[#allocation3 + $0x3c8] ss:$16 sps:$4 sm:$0xff]  }
 0x182   :  { %1724 = vmatprep.mubr.bf16.mxu0 %v3495_v43 }
 0x184   :  { %v3778_v24 = vpop.f32.mrb[28].mxu1 }
 0x185   :  { %v1399_v25 = vpop.f32.mrb[29].mxu1 }
 0x186   :  { %v3780_v26 = vpop.f32.mrb[30].mxu1 }
 0x187   :  { %v1402_v28 = vpop.f32.mrb[31].mxu1 }
 0x189   :  { %1725 = vmatmul.mubr.bf16.gmra.mrb[92].mxu0 %v3497_v48 }
 0x18a   :  { %1732 = vmatprep.mubr.bf16.mxu0 %v3501_v49 }
 0x18c   :  { %v3782_v34 = vpop.f32.mrb[32].mxu1 }
 0x18d   :  { %v1407_v35 = vpop.f32.mrb[33].mxu1 }
 0x18e   :  { %v3784_v36 = vpop.f32.mrb[34].mxu1 }
 0x18f   :  { %v1410_v39 = vpop.f32.mrb[35].mxu1 }
 0x191   :  { %1733 = vmatmul.mubr.bf16.gmra.mrb[96].mxu0 %v3503_v54 }
 0x192   :  { %1740 = vmatprep.mubr.bf16.mxu0 %v3507_v55 }
 0x194   :  { %v3786_v48 = vpop.f32.mrb[36].mxu1 }
 0x195   :  { %v1415_v49 = vpop.f32.mrb[37].mxu1 }
 0x196   :  { %v3788_v51 = vpop.f32.mrb[38].mxu1 }
 0x197   :  { %v1418_v54 = vpop.f32.mrb[39].mxu1 }
 0x199   :  { %1741 = vmatmul.mubr.bf16.gmra.mrb[100].mxu0 %v3509_v60 }
 0x19a   :  { %1748 = vmatprep.mubr.bf16.mxu0 %v3513_v61 }
 0x19c   :  { %v3790_v61 = vpop.f32.mrb[40].mxu1 }
 0x19d   :  { %v1423_v63 = vpop.f32.mrb[41].mxu1 }
 0x19e   :  { %v3792_v2 = vpop.f32.mrb[42].mxu1 }
 0x1a1   :  { %1749 = vmatmul.mubr.bf16.gmra.mrb[104].mxu0 %v3515_v3 }
 0x1a2   :  { %1756 = vmatprep.mubr.bf16.mxu0 %v3516_v4  ;;  %v1426_v4 = vpop.f32.mrb[43].mxu1 }
 0x1a4   :  { %v1542_v8 = vpop.f32.mrb[0].mxu0 }
 0x1a5   :  { %v1544_v10 = vpop.f32.mrb[1].mxu0  ;;  %2986 = vmatprep.mubr.f32.mxu1 %v1542_v8 }
 0x1a6   :  { %v1545_v11 = vpop.f32.mrb[2].mxu0  ;;  %v3794_v10 = vpop.f32.mrb[44].mxu1 }
 0x1a7   :  { %v1547_v13 = vpop.f32.mrb[3].mxu0  ;;  %2987 = vmatmul.mubr.f32.vlgmr.msra.gmra.mrb[84].mxu1 %v1545_v11 }
 0x1a9   :  { %1757 = vmatmul.mubr.bf16.gmra.mrb[108].mxu0 %v3518_v0  ;;  %v1431_v0 = vpop.f32.mrb[45].mxu1 }
 0x1aa   :  { %1764 = vmatprep.mubr.bf16.mxu0 %v3519_v12  ;;  %v3796_v11 = vpop.f32.mrb[46].mxu1 }
 0x1ab   :  { %v1434_v13 = vpop.f32.mrb[47].mxu1 }
 0x1ac   :  { %v1550_v17 = vpop.f32.mrb[4].mxu0 }
 0x1ad   :  { %v1552_v19 = vpop.f32.mrb[5].mxu0  ;;  %2989 = vmatprep.mubr.f32.mxu1 %v1550_v17  ;;  %v3798_v17 = vpop.f32.mrb[48].mxu1 }
 0x1ae   :  { %v1553_v21 = vpop.f32.mrb[6].mxu0  ;;  %v1439_v19 = vpop.f32.mrb[49].mxu1 }
 0x1af   :  { %v1555_v23 = vpop.f32.mrb[7].mxu0  ;;  %2990 = vmatmul.mubr.f32.gmra.mrb[86].mxu1 %v1553_v21  ;;  %v3800_v21 = vpop.f32.mrb[50].mxu1 }
 0x1b1   :  { %1765 = vmatmul.mubr.bf16.gmra.mrb[112].mxu0 %v3521_v20 }
 0x1b2   :  { %1772 = vmatprep.mubr.bf16.mxu0 %v3522_v22  ;;  %v1442_v22 = vpop.f32.mrb[51].mxu1 }
 0x1b4   :  { %v1558_v27 = vpop.f32.mrb[8].mxu0  ;;  %v3802_v23 = vpop.f32.mrb[52].mxu1 }
 0x1b5   :  { %v1560_v29 = vpop.f32.mrb[9].mxu0  ;;  %2992 = vmatprep.mubr.f32.mxu1 %v1558_v27  ;;  %v1447_v25 = vpop.f32.mrb[53].mxu1 }
 0x1b6   :  { %v1561_v31 = vpop.f32.mrb[10].mxu0  ;;  %v3804_v27 = vpop.f32.mrb[54].mxu1 }
 0x1b7   :  { %v1563_v33 = vpop.f32.mrb[11].mxu0  ;;  %2993 = vmatmul.mubr.f32.gmra.mrb[88].mxu1 %v1561_v31  ;;  %v1450_v29 = vpop.f32.mrb[55].mxu1 }
 0x1b9   :  { %1773 = vmatmul.mubr.bf16.gmra.mrb[116].mxu0 %v3524_v30 }
 0x1ba   :  { %1780 = vmatprep.mubr.bf16.mxu0 %v3525_v32 }
 0x1bc   :  { %v1566_v37 = vpop.f32.mrb[12].mxu0  ;;  %v3806_v31 = vpop.f32.mrb[56].mxu1 }
 0x1bd   :  { %v1568_v41 = vpop.f32.mrb[13].mxu0  ;;  %2995 = vmatprep.mubr.f32.mxu1 %v1566_v37  ;;  %v1455_v33 = vpop.f32.mrb[57].mxu1 }
 0x1be   :  { %v1569_v43 = vpop.f32.mrb[14].mxu0  ;;  %v3808_v37 = vpop.f32.mrb[58].mxu1 }
 0x1bf   :  { %v1571_v47 = vpop.f32.mrb[15].mxu0  ;;  %2996 = vmatmul.mubr.f32.gmra.mrb[90].mxu1 %v1569_v43  ;;  %v1458_v39 = vpop.f32.mrb[59].mxu1 }
 0x1c1   :  { %1781 = vmatmul.mubr.bf16.gmra.mrb[120].mxu0 %v3527_v42 }
 0x1c2   :  { %1788 = vmatprep.mubr.bf16.mxu0 %v3528_v45 }
 0x1c4   :  { %v1574_v53 = vpop.f32.mrb[16].mxu0  ;;  %v3810_v41 = vpop.f32.mrb[60].mxu1 }
 0x1c5   :  { %v1576_v55 = vpop.f32.mrb[17].mxu0  ;;  %2998 = vmatprep.mubr.f32.mxu1 %v1574_v53  ;;  %v1463_v42 = vpop.f32.mrb[61].mxu1 }
 0x1c6   :  { %v1577_v59 = vpop.f32.mrb[18].mxu0  ;;  %v3812_v43 = vpop.f32.mrb[62].mxu1 }
 0x1c7   :  { %v1579_v60 = vpop.f32.mrb[19].mxu0  ;;  %2999 = vmatmul.mubr.f32.gmra.mrb[92].mxu1 %v1577_v59  ;;  %v1466_v47 = vpop.f32.mrb[63].mxu1 }
 0x1c9   :  { %1789 = vmatmul.mubr.bf16.gmra.mrb[124].mxu0 %v3530_v57 }
 0x1cc   :  { %v1582_v3 = vpop.f32.mrb[20].mxu0  ;;  %v3814_v53 = vpop.f32.mrb[64].mxu1 }
 0x1cd   :  { %v1584_v6 = vpop.f32.mrb[21].mxu0  ;;  %3001 = vmatprep.mubr.f32.mxu1 %v1582_v3  ;;  %v1471_v55 = vpop.f32.mrb[65].mxu1 }
 0x1ce   :  { %v1585_v8 = vpop.f32.mrb[22].mxu0  ;;  %v3816_v59 = vpop.f32.mrb[66].mxu1 }
 0x1cf   :  { %v1587_v9 = vpop.f32.mrb[23].mxu0  ;;  %3002 = vmatmul.mubr.f32.gmra.mrb[94].mxu1 %v1585_v8  ;;  %v1474_v60 = vpop.f32.mrb[67].mxu1 }
 0x1d4   :  { %v1590_v12 = vpop.f32.mrb[24].mxu0  ;;  %v3818_v63 = vpop.f32.mrb[68].mxu1 }
 0x1d5   :  { %v1592_v15 = vpop.f32.mrb[25].mxu0  ;;  %3004 = vmatprep.mubr.f32.mxu1 %v1590_v12  ;;  %v1479_v3 = vpop.f32.mrb[69].mxu1 }
 0x1d6   :  { %v1593_v18 = vpop.f32.mrb[26].mxu0  ;;  %v3820_v4 = vpop.f32.mrb[70].mxu1 }
 0x1d7   :  { %v1595_v20 = vpop.f32.mrb[27].mxu0  ;;  %3005 = vmatmul.mubr.f32.gmra.mrb[96].mxu1 %v1593_v18  ;;  %v1482_v8 = vpop.f32.mrb[71].mxu1 }
 0x1dc   :  { %v1598_v28 = vpop.f32.mrb[28].mxu0  ;;  %v3822_v0 = vpop.f32.mrb[72].mxu1 }
 0x1dd   :  { %v1600_v30 = vpop.f32.mrb[29].mxu0  ;;  %3007 = vmatprep.mubr.f32.mxu1 %v1598_v28  ;;  %v1487_v13 = vpop.f32.mrb[73].mxu1 }
 0x1de   :  { %v1601_v32 = vpop.f32.mrb[30].mxu0  ;;  %v3824_v18 = vpop.f32.mrb[74].mxu1 }
 0x1df   :  { %v1603_v35 = vpop.f32.mrb[31].mxu0  ;;  %3008 = vmatmul.mubr.f32.gmra.mrb[98].mxu1 %v1601_v32  ;;  %v1490_v19 = vpop.f32.mrb[75].mxu1 }
 0x1e4   :  { %v1606_v45 = vpop.f32.mrb[32].mxu0  ;;  %v3826_v20 = vpop.f32.mrb[76].mxu1 }
 0x1e5   :  { %v1608_v49 = vpop.f32.mrb[33].mxu0  ;;  %3010 = vmatprep.mubr.f32.mxu1 %v1606_v45  ;;  %v1495_v22 = vpop.f32.mrb[77].mxu1 }
 0x1e6   :  { %v1609_v54 = vpop.f32.mrb[34].mxu0  ;;  %v3828_v25 = vpop.f32.mrb[78].mxu1 }
 0x1e7   :  { %v1611_v57 = vpop.f32.mrb[35].mxu0  ;;  %3011 = vmatmul.mubr.f32.gmra.mrb[100].mxu1 %v1609_v54  ;;  %v1498_v29 = vpop.f32.mrb[79].mxu1 }
 0x1ec   :  { %v1614_v6 = vpop.f32.mrb[36].mxu0  ;;  %v3830_v32 = vpop.f32.mrb[80].mxu1 }
 0x1ed   :  { %v1616_v9 = vpop.f32.mrb[37].mxu0  ;;  %3013 = vmatprep.mubr.f32.mxu1 %v1614_v6  ;;  %v1503_v35 = vpop.f32.mrb[81].mxu1 }
 0x1ee   :  { %v1617_v12 = vpop.f32.mrb[38].mxu0  ;;  %v3832_v42 = vpop.f32.mrb[82].mxu1 }
 0x1ef   :  { %v1619_v15 = vpop.f32.mrb[39].mxu0  ;;  %3014 = vmatmul.mubr.f32.gmra.mrb[102].mxu1 %v1617_v12  ;;  %v1506_v45 = vpop.f32.mrb[83].mxu1 }
 0x1f4   :  { %v1622_v28 = vpop.f32.mrb[40].mxu0 }
 0x1f5   :  { %v1624_v30 = vpop.f32.mrb[41].mxu0  ;;  %3016 = vmatprep.mubr.f32.mxu1 %v1622_v28 }
 0x1f6   :  { %v1625_v33 = vpop.f32.mrb[42].mxu0 }
 0x1f7   :  { %v1627_v39 = vpop.f32.mrb[43].mxu0  ;;  %3017 = vmatmul.mubr.f32.gmra.mrb[104].mxu1 %v1625_v33 }
 0x1fc   :  { %v1630_v47 = vpop.f32.mrb[44].mxu0 }
 0x1fd   :  { %v1631_v49 = vadd.f32 %v1630_v47, %v3750_v38  ;;  %v1632_v54 = vpop.f32.mrb[45].mxu0 }
 0x1fe   :  { %v1633_v55 = vpop.f32.mrb[46].mxu0 }
 0x1ff   :  { %v1634_v57 = vadd.f32 %v1633_v55, %v3752_v40  ;;  %v1635_v60 = vpop.f32.mrb[47].mxu0  ;;  %3019 = vmatprep.mubr.f32.mxu1 %v1631_v49 }
 0x201   :  { %3020 = vmatmul.mubr.f32.gmra.mrb[106].mxu1 %v1634_v57 }
 0x204   :  { %v1638_v3 = vpop.f32.mrb[48].mxu0 }
 0x205   :  { %v1639_v6 = vadd.f32 %v1638_v3, %v3754_v44  ;;  %v1640_v8 = vpop.f32.mrb[49].mxu0 }
 0x206   :  { %v1641_v9 = vpop.f32.mrb[50].mxu0 }
 0x207   :  { %v1642_v12 = vadd.f32 %v1641_v9, %v3756_v46  ;;  %v1643_v13 = vpop.f32.mrb[51].mxu0  ;;  %3022 = vmatprep.mubr.f32.mxu1 %v1639_v6 }
 0x209   :  { %3023 = vmatmul.mubr.f32.gmra.mrb[108].mxu1 %v1642_v12 }
 0x20c   :  { %v1646_v15 = vpop.f32.mrb[52].mxu0 }
 0x20d   :  { %v1647_v38 = vadd.f32 %v1646_v15, %v3758_v50  ;;  %v1648_v19 = vpop.f32.mrb[53].mxu0 }
 0x20e   :  { %v1649_v22 = vpop.f32.mrb[54].mxu0 }
 0x20f   :  { %v1650_v40 = vadd.f32 %v1649_v22, %v3760_v52  ;;  %v1651_v28 = vpop.f32.mrb[55].mxu0  ;;  %3025 = vmatprep.mubr.f32.mxu1 %v1647_v38 }
 0x211   :  { %3026 = vmatmul.mubr.f32.gmra.mrb[110].mxu1 %v1650_v40 }
 0x214   :  { %v1654_v29 = vpop.f32.mrb[56].mxu0 }
 0x215   :  { %v1655_v44 = vadd.f32 %v1654_v29, %v3762_v56  ;;  %v1656_v30 = vpop.f32.mrb[57].mxu0 }
 0x216   :  { %v1657_v33 = vpop.f32.mrb[58].mxu0 }
 0x217   :  { %v1658_v46 = vadd.f32 %v1657_v33, %v3764_v58  ;;  %v1659_v35 = vpop.f32.mrb[59].mxu0  ;;  %3028 = vmatprep.mubr.f32.mxu1 %v1655_v44 }
 0x219   :  { %3029 = vmatmul.mubr.f32.gmra.mrb[112].mxu1 %v1658_v46 }
 0x21c   :  { %v1662_v39 = vpop.f32.mrb[60].mxu0 }
 0x21d   :  { %v1663_v50 = vadd.f32 %v1662_v39, %v3766_v62  ;;  %v1664_v45 = vpop.f32.mrb[61].mxu0 }
 0x21e   :  { %v1665_v47 = vpop.f32.mrb[62].mxu0 }
 0x21f   :  { %v1666_v52 = vadd.f32 %v1665_v47, %v3768_v1  ;;  %v1667_v49 = vpop.f32.mrb[63].mxu0  ;;  %3031 = vmatprep.mubr.f32.mxu1 %v1663_v50 }
 0x221   :  { %3032 = vmatmul.mubr.f32.gmra.mrb[114].mxu1 %v1666_v52 }
 0x224   :  { %v1670_v54 = vpop.f32.mrb[64].mxu0 }
 0x225   :  { %v1671_v56 = vadd.f32 %v1670_v54, %v3770_v5  ;;  %v1672_v55 = vpop.f32.mrb[65].mxu0 }
 0x226   :  { %v1673_v57 = vpop.f32.mrb[66].mxu0 }
 0x227   :  { %v1674_v58 = vadd.f32 %v1673_v57, %v3772_v7  ;;  %v1675_v60 = vpop.f32.mrb[67].mxu0  ;;  %3034 = vmatprep.mubr.f32.mxu1 %v1671_v56 }
 0x229   :  { %3035 = vmatmul.mubr.f32.gmra.mrb[116].mxu1 %v1674_v58 }
 0x22c   :  { %v1678_v3 = vpop.f32.mrb[68].mxu0 }
 0x22d   :  { %v1679_v62 = vadd.f32 %v1678_v3, %v3774_v14  ;;  %v1680_v6 = vpop.f32.mrb[69].mxu0 }
 0x22e   :  { %v1681_v8 = vpop.f32.mrb[70].mxu0 }
 0x22f   :  { %v1682_v1 = vadd.f32 %v1681_v8, %v3776_v16  ;;  %v1683_v9 = vpop.f32.mrb[71].mxu0  ;;  %3037 = vmatprep.mubr.f32.mxu1 %v1679_v62 }
 0x231   :  { %3038 = vmatmul.mubr.f32.gmra.mrb[118].mxu1 %v1682_v1 }
 0x234   :  { %v1686_v12 = vpop.f32.mrb[72].mxu0 }
 0x235   :  { %v1687_v5 = vadd.f32 %v1686_v12, %v3778_v24  ;;  %v1688_v13 = vpop.f32.mrb[73].mxu0 }
 0x236   :  { %v1689_v15 = vpop.f32.mrb[74].mxu0 }
 0x237   :  { %v1690_v7 = vadd.f32 %v1689_v15, %v3780_v26  ;;  %v1691_v38 = vpop.f32.mrb[75].mxu0  ;;  %3040 = vmatprep.mubr.f32.mxu1 %v1687_v5 }
 0x239   :  { %3041 = vmatmul.mubr.f32.gmra.mrb[120].mxu1 %v1690_v7 }
 0x23c   :  { %v1694_v19 = vpop.f32.mrb[76].mxu0 }
 0x23d   :  { %v1695_v14 = vadd.f32 %v1694_v19, %v3782_v34  ;;  %v1696_v22 = vpop.f32.mrb[77].mxu0 }
 0x23e   :  { %v1697_v40 = vpop.f32.mrb[78].mxu0 }
 0x23f   :  { %v1698_v16 = vadd.f32 %v1697_v40, %v3784_v36  ;;  %v1699_v28 = vpop.f32.mrb[79].mxu0  ;;  %3043 = vmatprep.mubr.f32.mxu1 %v1695_v14 }
 0x241   :  { %3044 = vmatmul.mubr.f32.gmra.mrb[122].mxu1 %v1698_v16 }
 0x244   :  { %v1702_v29 = vpop.f32.mrb[80].mxu0 }
 0x245   :  { %v1703_v24 = vadd.f32 %v1702_v29, %v3786_v48  ;;  %v1704_v44 = vpop.f32.mrb[81].mxu0 }
 0x246   :  { %v1705_v30 = vpop.f32.mrb[82].mxu0 }
 0x247   :  { %v1706_v26 = vadd.f32 %v1705_v30, %v3788_v51  ;;  %v1707_v33 = vpop.f32.mrb[83].mxu0  ;;  %3046 = vmatprep.mubr.f32.mxu1 %v1703_v24 }
 0x249   :  { %3047 = vmatmul.mubr.f32.gmra.mrb[124].mxu1 %v1706_v26 }
 0x24c   :  { %v1710_v46 = vpop.f32.mrb[84].mxu0 }
 0x24d   :  { %v1711_v34 = vadd.f32 %v1710_v46, %v3790_v61  ;;  %v1712_v35 = vpop.f32.mrb[85].mxu0 }
 0x24e   :  { %v1713_v39 = vpop.f32.mrb[86].mxu0 }
 0x24f   :  { %v1714_v36 = vadd.f32 %v1713_v39, %v3792_v2  ;;  %v1715_v50 = vpop.f32.mrb[87].mxu0  ;;  %3049 = vmatprep.mubr.f32.mxu1 %v1711_v34 }
 0x251   :  { %3050 = vmatmul.mubr.f32.gmra.mrb[126].mxu1 %v1714_v36 }
 0x254   :  { %v1718_v45 = vpop.f32.mrb[88].mxu0 }
 0x255   :  { %v1719_v48 = vadd.f32 %v1718_v45, %v3794_v10  ;;  %v1720_v47 = vpop.f32.mrb[89].mxu0 }
 0x256   :  { %v1721_v52 = vpop.f32.mrb[90].mxu0 }
 0x257   :  { %v1722_v51 = vadd.f32 %v1721_v52, %v3796_v11  ;;  %v1723_v49 = vpop.f32.mrb[91].mxu0  ;;  %3052 = vmatprep.mubr.f32.mxu1 %v1719_v48 }
 0x259   :  { %3053 = vmatmul.mubr.f32.gmra.mrb[128].mxu1 %v1722_v51 }
 0x25c   :  { %v1726_v54 = vpop.f32.mrb[92].mxu0 }
 0x25d   :  { %v1727_v61 = vadd.f32 %v1726_v54, %v3798_v17  ;;  %v1728_v56 = vpop.f32.mrb[93].mxu0 }
 0x25e   :  { %v1729_v55 = vpop.f32.mrb[94].mxu0 }
 0x25f   :  { %v1730_v2 = vadd.f32 %v1729_v55, %v3800_v21  ;;  %v1731_v57 = vpop.f32.mrb[95].mxu0  ;;  %3055 = vmatprep.mubr.f32.mxu1 %v1727_v61 }
 0x261   :  { %3056 = vmatmul.mubr.f32.gmra.mrb[130].mxu1 %v1730_v2 }
 0x264   :  { %v1734_v58 = vpop.f32.mrb[96].mxu0 }
 0x265   :  { %v1735_v10 = vadd.f32 %v1734_v58, %v3802_v23  ;;  %v1736_v60 = vpop.f32.mrb[97].mxu0 }
 0x266   :  { %v1737_v3 = vpop.f32.mrb[98].mxu0 }
 0x267   :  { %v1738_v11 = vadd.f32 %v1737_v3, %v3804_v27  ;;  %v1739_v62 = vpop.f32.mrb[99].mxu0  ;;  %3058 = vmatprep.mubr.f32.mxu1 %v1735_v10 }
 0x269   :  { %3059 = vmatmul.mubr.f32.gmra.mrb[132].mxu1 %v1738_v11 }
 0x26c   :  { %v1742_v6 = vpop.f32.mrb[100].mxu0 }
 0x26d   :  { %v1743_v17 = vadd.f32 %v1742_v6, %v3806_v31  ;;  %v1744_v8 = vpop.f32.mrb[101].mxu0  ;;  %v3869_v31 = vld [vmem:[%s4021_s4] ss:$0 sm:$0xff] }
 0x26e   :  { %v1745_v1 = vpop.f32.mrb[102].mxu0 }
 0x26f   :  { %v1746_v21 = vadd.f32 %v1745_v1, %v3808_v37  ;;  %v1747_v9 = vpop.f32.mrb[103].mxu0  ;;  %3061 = vmatprep.mubr.f32.mxu1 %v1743_v17 }
 0x271   :  { %3062 = vmatmul.mubr.f32.gmra.mrb[134].mxu1 %v1746_v21 }
 0x274   :  { %v1750_v12 = vpop.f32.mrb[104].mxu0 }
 0x275   :  { %v1751_v23 = vadd.f32 %v1750_v12, %v3810_v41  ;;  %v1752_v5 = vpop.f32.mrb[105].mxu0 }
 0x276   :  { %v1753_v13 = vpop.f32.mrb[106].mxu0 }
 0x277   :  { %v1754_v27 = vadd.f32 %v1753_v13, %v3812_v43  ;;  %v1755_v15 = vpop.f32.mrb[107].mxu0  ;;  %3064 = vmatprep.mubr.f32.mxu1 %v1751_v23 }
 0x279   :  { %3065 = vmatmul.mubr.f32.gmra.mrb[136].mxu1 %v1754_v27 }
 0x27a   :  { %v2988_v7 = vpop.f32.mrb[84].mxu1 }
 0x27b   :  { %v2087_v37 = vadd.f32 %v2988_v7, %v3869_v31  ;;  %v2081_v38 = vpop.f32.mrb[85].mxu1 }
 0x27c   :  { %v2082_v19 = vadd.f32 %v3869_v31, %v2081_v38  ;;  %v1758_v14 = vpop.f32.mrb[108].mxu0 }
 0x27d   :  { %v2401_v41 = vmax.f32 %v2087_v37, 0.0  ;;  %v1759_v22 = vadd.f32 %v1758_v14, %v3814_v53  ;;  %v1760_v40 = vpop.f32.mrb[109].mxu0 }
 0x27e   :  { %v2400_v43 = vmax.f32 %v2082_v19, 0.0  ;;  %v1761_v16 = vpop.f32.mrb[110].mxu0 }
 0x27f   :  { %v1762_v28 = vadd.f32 %v1761_v16, %v3816_v59  ;;  %v1763_v29 = vpop.f32.mrb[111].mxu0  ;;  %3067 = vmatprep.mubr.f32.mxu1 %v1759_v22 }
 0x280   :  { %v3875_v24 = vpack.c.bf16 %v2401_v41, %v2400_v43 }
 0x281   :  { %3068 = vmatmul.mubr.f32.gmra.mrb[138].mxu1 %v1762_v28 }
 0x282   :  { %v2991_v44 = vpop.f32.mrb[86].mxu1 }
 0x283   :  { %v2097_v30 = vadd.f32 %v2991_v44, %v3869_v31  ;;  %v2091_v26 = vpop.f32.mrb[87].mxu1 }
 0x284   :  { %v2092_v33 = vadd.f32 %v3869_v31, %v2091_v26  ;;  %v1766_v46 = vpop.f32.mrb[112].mxu0 }
 0x285   :  { %v2403_v34 = vmax.f32 %v2097_v30, 0.0  ;;  %v1767_v53 = vadd.f32 %v1766_v46, %v3818_v63  ;;  %v1768_v35 = vpop.f32.mrb[113].mxu0 }
 0x286   :  { %v2402_v39 = vmax.f32 %v2092_v33, 0.0  ;;  %v1769_v36 = vpop.f32.mrb[114].mxu0 }
 0x287   :  { %v1770_v59 = vadd.f32 %v1769_v36, %v3820_v4  ;;  %v1771_v50 = vpop.f32.mrb[115].mxu0  ;;  %3070 = vmatprep.mubr.f32.mxu1 %v1767_v53 }
 0x288   :  { %v3881_v45 = vpack.c.bf16 %v2403_v34, %v2402_v39 }
 0x289   :  { %3071 = vmatmul.mubr.f32.gmra.mrb[140].mxu1 %v1770_v59 }
 0x28a   :  { %v2994_v48 = vpop.f32.mrb[88].mxu1 }
 0x28b   :  { %v2107_v47 = vadd.f32 %v2994_v48, %v3869_v31  ;;  %v2101_v52 = vpop.f32.mrb[89].mxu1 }
 0x28c   :  { %v2102_v51 = vadd.f32 %v3869_v31, %v2101_v52  ;;  %v1774_v49 = vpop.f32.mrb[116].mxu0 }
 0x28d   :  { %v2405_v54 = vmax.f32 %v2107_v47, 0.0  ;;  %v1775_v63 = vadd.f32 %v1774_v49, %v3822_v0  ;;  %v1776_v61 = vpop.f32.mrb[117].mxu0 }
 0x28e   :  { %v2404_v56 = vmax.f32 %v2102_v51, 0.0  ;;  %v1777_v55 = vpop.f32.mrb[118].mxu0  ;;  %v2466_v51 = vlaneseq }
 0x28f   :  { %v1778_v4 = vadd.f32 %v1777_v55, %v3824_v18  ;;  %v1779_v2 = vpop.f32.mrb[119].mxu0  ;;  %3073 = vmatprep.mubr.f32.mxu1 %v1775_v63  ;;  %v3921_v55 = vld [vmem:[%s4019_s2] sm:$0xf]  ;;  %s3635_s2 = smov [#allocation9]  }
 0x290   :  { %v3887_v57 = vpack.c.bf16 %v2405_v54, %v2404_v56  ;;  %v3915_v63 = vshrl.u32 %v2466_v51, 7  ;;  %s2633_s10 = sshll.u32 %s3635_s2, 4  ;;  %s2634_s10 = int_to_ptr.vmem [resolvable:$true] %s2633_s10 }
 0x291   :  { %3074 = vmatmul.mubr.f32.gmra.mrb[142].mxu1 %v1778_v4  ;;  %s3597_s11 = scalar_lea.vmem %s2634_s10, 16  ;;  %s3601_s12 = scalar_lea.vmem %s2634_s10, 32 }
 0x292   :  { %v2997_v58 = vpop.f32.mrb[90].mxu1  ;;  %v2472_v56 = vsub.s32 1, %v3915_v63  ;;  %v2476_v51 = vsub.s32 2, %v3915_v63  ;;  %p3598_p10 = scmp.ne.s32.totalorder %s2634_s10, %s3597_s11  ;;  %p3602_p11 = scmp.lt.s32.totalorder %s2634_s10, %s2634_s10 }
 0x293   :  { %v2117_v10 = vadd.f32 %v2997_v58, %v3869_v31  ;;  %v2111_v60 = vpop.f32.mrb[91].mxu1  ;;  %p3603_p12 = scmp.lt.s32.totalorder %s3601_s12, %s3597_s11 }
 0x294   :  { %v2112_v3 = vadd.f32 %v3869_v31, %v2111_v60  ;;  %v1782_v11 = vpop.f32.mrb[120].mxu0  ;;  %v2473_v2 = vrot.slane %v3921_v55, %v2472_v56  ;;  %v3954_v56 = vrot.slane %v3921_v55, %v2476_v51 }
 0x295   :  { %v2407_v62 = vmax.f32 %v2117_v10, 0.0  ;;  %v1783_v0 = vadd.f32 %v1782_v11, %v3826_v20  ;;  %v1784_v6 = vpop.f32.mrb[121].mxu0  ;;  %p3604_p13 = por %p3603_p12, %p3602_p11 }
 0x296   :  { %v2406_v17 = vmax.f32 %v2112_v3, 0.0  ;;  %v1785_v8 = vpop.f32.mrb[122].mxu0 }
 0x297   :  { %v1786_v18 = vadd.f32 %v1785_v8, %v3828_v25  ;;  %v1787_v1 = vpop.f32.mrb[123].mxu0  ;;  %3076 = vmatprep.mubr.f32.mxu1 %v1783_v0  ;;  %p3605_p0 = pnand %p3604_p13, %p3598_p10 }
 0x298   :  { %v3893_v21 = vpack.c.bf16 %v2407_v62, %v2406_v17 }
 0x299   :  { %3077 = vmatmul.mubr.f32.gmra.mrb[144].mxu1 %v1786_v18 }
 0x29a   :  { %v3000_v9 = vpop.f32.mrb[92].mxu1 }
 0x29b   :  { %v2127_v12 = vadd.f32 %v3000_v9, %v3869_v31  ;;  %v2121_v23 = vpop.f32.mrb[93].mxu1 }
 0x29c   :  { %v2122_v5 = vadd.f32 %v3869_v31, %v2121_v23  ;;  %v1790_v13 = vpop.f32.mrb[124].mxu0 }
 0x29d   :  { %v2409_v27 = vmax.f32 %v2127_v12, 0.0  ;;  %v1791_v20 = vadd.f32 %v1790_v13, %v3830_v32  ;;  %v1792_v15 = vpop.f32.mrb[125].mxu0 }
 0x29e   :  { %v2408_v7 = vmax.f32 %v2122_v5, 0.0  ;;  %v1793_v37 = vpop.f32.mrb[126].mxu0 }
 0x29f   :  { %v1794_v25 = vadd.f32 %v1793_v37, %v3832_v42  ;;  %v1795_v38 = vpop.f32.mrb[127].mxu0  ;;  %3079 = vmatprep.mubr.f32.mxu1 %v1791_v20 }
 0x2a0   :  { %v3899_v19 = vpack.c.bf16 %v2409_v27, %v2408_v7 }
 0x2a1   :  { %3080 = vmatmul.mubr.f32.gmra.mrb[146].mxu1 %v1794_v25 }
 0x2a2   :  { %v3003_v14 = vpop.f32.mrb[94].mxu1  ;;  %2550 = vmatprep.mubr.f32.mxu1 %v2473_v2 }
 0x2a3   :  { %v2137_v41 = vadd.f32 %v3003_v14, %v3869_v31  ;;  %v2131_v22 = vpop.f32.mrb[95].mxu1 }
 0x2a4   :  { %v2132_v40 = vadd.f32 %v3869_v31, %v2131_v22 }
 0x2a5   :  { %v2411_v43 = vmax.f32 %v2137_v41, 0.0 }
 0x2a6   :  { %v2410_v16 = vmax.f32 %v2132_v40, 0.0 }
 0x2a8   :  { %v3903_v28 = vpack.c.bf16 %v2411_v43, %v2410_v16 }
 0x2aa   :  { %v3006_v32 = vpop.f32.mrb[96].mxu1 }
 0x2ab   :  { %v2147_v29 = vadd.f32 %v3006_v32, %v3869_v31  ;;  %v2141_v44 = vpop.f32.mrb[97].mxu1 }
 0x2ac   :  { %v2142_v42 = vadd.f32 %v3869_v31, %v2141_v44 }
 0x2ad   :  { %v2413_v30 = vmax.f32 %v2147_v29, 0.0 }
 0x2ae   :  { %v2412_v26 = vmax.f32 %v2142_v42, 0.0 }
 0x2b0   :  { %v3907_v33 = vpack.c.bf16 %v2413_v30, %v2412_v26 }
 0x2b2   :  { %v3009_v46 = vpop.f32.mrb[98].mxu1 }
 0x2b3   :  { %v2157_v34 = vadd.f32 %v3009_v46, %v3869_v31  ;;  %v2151_v53 = vpop.f32.mrb[99].mxu1 }
 0x2b4   :  { %v2152_v35 = vadd.f32 %v3869_v31, %v2151_v53 }
 0x2b5   :  { %v2415_v39 = vmax.f32 %v2157_v34, 0.0 }
 0x2b6   :  { %v2414_v36 = vmax.f32 %v2152_v35, 0.0 }
 0x2b8   :  { %v3911_v59 = vpack.c.bf16 %v2415_v39, %v2414_v36 }
 0x2ba   :  { %v3012_v50 = vpop.f32.mrb[100].mxu1 }
 0x2bb   :  { %v2167_v48 = vadd.f32 %v3012_v50, %v3869_v31  ;;  %v2161_v47 = vpop.f32.mrb[101].mxu1  ;;  %v2468_v50 = vsub.s32 0, %v3915_v63 }
 0x2bc   :  { %v2162_v52 = vadd.f32 %v3869_v31, %v2161_v47 }
 0x2bd   :  { %v2417_v49 = vmax.f32 %v2167_v48, 0.0 }
 0x2be   :  { %v2416_v54 = vmax.f32 %v2162_v52, 0.0  ;;  %v2469_v52 = vrot.slane %v3921_v55, %v2468_v50 }
 0x2c0   :  { %v3114_v61 = vpack.c.bf16 %v2417_v49, %v2416_v54 }
 0x2c2   :  { %v3015_v4 = vpop.f32.mrb[102].mxu1  ;;  %3115 = vmatprep.subr.bf16.mxu1 %v3114_v61 }
 0x2c3   :  { %v2177_v58 = vadd.f32 %v3015_v4, %v3869_v31  ;;  %v2171_v10 = vpop.f32.mrb[103].mxu1  ;;  %3117 = vmatpush3.bf16.msra.mxu1 %v3875_v24 }
 0x2c4   :  { %v2172_v60 = vadd.f32 %v3869_v31, %v2171_v10 }
 0x2c5   :  { %v2419_v3 = vmax.f32 %v2177_v58, 0.0 }
 0x2c6   :  { %v2418_v11 = vmax.f32 %v2172_v60, 0.0 }
 0x2c8   :  { %v3118_v62 = vpack.c.bf16 %v2419_v3, %v2418_v11 }
 0x2ca   :  { %v3018_v0 = vpop.f32.mrb[104].mxu1  ;;  %3119 = vmatprep.subr.bf16.mxu1 %v3118_v62 }
 0x2cb   :  { %v2187_v6 = vadd.f32 %v3018_v0, %v3869_v31  ;;  %v2181_v17 = vpop.f32.mrb[105].mxu1  ;;  %3121 = vmatpush3.bf16.msra.mxu1 %v3881_v45 }
 0x2cc   :  { %v2182_v8 = vadd.f32 %v3869_v31, %v2181_v17 }
 0x2cd   :  { %v2421_v18 = vmax.f32 %v2187_v6, 0.0 }
 0x2ce   :  { %v2420_v1 = vmax.f32 %v2182_v8, 0.0 }
 0x2d0   :  { %v3122_v9 = vpack.c.bf16 %v2421_v18, %v2420_v1 }
 0x2d2   :  { %3123 = vmatprep.subr.bf16.mxu1 %v3122_v9 }
 0x2d3   :  { %3125 = vmatpush3.bf16.msra.mxu1 %v3887_v57 }
 0x2d4   :  { %v3021_v24 = vpop.f32.mrb[106].mxu1 }
 0x2d5   :  { %v2197_v12 = vadd.f32 %v3021_v24, %v3869_v31  ;;  %v2191_v23 = vpop.f32.mrb[107].mxu1 }
 0x2d6   :  { %v2192_v5 = vadd.f32 %v3869_v31, %v2191_v23 }
 0x2d7   :  { %v2423_v13 = vmax.f32 %v2197_v12, 0.0 }
 0x2d8   :  { %v2422_v27 = vmax.f32 %v2192_v5, 0.0 }
 0x2da   :  { %v3126_v20 = vpack.c.bf16 %v2423_v13, %v2422_v27 }
 0x2dc   :  { %v3024_v15 = vpop.f32.mrb[108].mxu1  ;;  %3127 = vmatprep.subr.bf16.mxu1 %v3126_v20 }
 0x2dd   :  { %v2207_v45 = vadd.f32 %v3024_v15, %v3869_v31  ;;  %v2201_v7 = vpop.f32.mrb[109].mxu1  ;;  %3129 = vmatpush3.bf16.msra.mxu1 %v3893_v21 }
 0x2de   :  { %v2202_v37 = vadd.f32 %v3869_v31, %v2201_v7 }
 0x2df   :  { %v2425_v25 = vmax.f32 %v2207_v45, 0.0 }
 0x2e0   :  { %v2424_v57 = vmax.f32 %v2202_v37, 0.0 }
 0x2e2   :  { %v3130_v38 = vpack.c.bf16 %v2425_v25, %v2424_v57 }
 0x2e4   :  { %v3027_v14 = vpop.f32.mrb[110].mxu1  ;;  %3131 = vmatprep.subr.bf16.mxu1 %v3130_v38 }
 0x2e5   :  { %v2217_v41 = vadd.f32 %v3027_v14, %v3869_v31  ;;  %v2211_v22 = vpop.f32.mrb[111].mxu1  ;;  %3133 = vmatpush3.bf16.msra.mxu1 %v3899_v19 }
 0x2e6   :  { %v2212_v40 = vadd.f32 %v3869_v31, %v2211_v22 }
 0x2e7   :  { %v2427_v43 = vmax.f32 %v2217_v41, 0.0 }
 0x2e8   :  { %v2426_v16 = vmax.f32 %v2212_v40, 0.0 }
 0x2ea   :  { %v3134_v32 = vpack.c.bf16 %v2427_v43, %v2426_v16 }
 0x2ec   :  { %v3030_v29 = vpop.f32.mrb[112].mxu1  ;;  %3135 = vmatprep.subr.bf16.mxu1 %v3134_v32 }
 0x2ed   :  { %v2227_v21 = vadd.f32 %v3030_v29, %v3869_v31  ;;  %v2221_v44 = vpop.f32.mrb[113].mxu1  ;;  %3137 = vmatpush3.bf16.msra.mxu1 %v3903_v28  ;;  %v2480_v28 = vsub.s32 3, %v3915_v63 }
 0x2ee   :  { %v2222_v42 = vadd.f32 %v3869_v31, %v2221_v44 }
 0x2ef   :  { %v2429_v30 = vmax.f32 %v2227_v21, 0.0 }
 0x2f0   :  { %v2428_v26 = vmax.f32 %v2222_v42, 0.0 }
 0x2f2   :  { %v3138_v46 = vpack.c.bf16 %v2429_v30, %v2428_v26 }
 0x2f4   :  { %v3033_v34 = vpop.f32.mrb[114].mxu1  ;;  %3139 = vmatprep.subr.bf16.mxu1 %v3138_v46 }
 0x2f5   :  { %v2237_v19 = vadd.f32 %v3033_v34, %v3869_v31  ;;  %v2231_v53 = vpop.f32.mrb[115].mxu1  ;;  %3141 = vmatpush3.bf16.msra.mxu1 %v3907_v33  ;;  %v2481_v33 = vrot.slane %v3921_v55, %v2480_v28 }
 0x2f6   :  { %v2232_v35 = vadd.f32 %v3869_v31, %v2231_v53 }
 0x2f7   :  { %v2431_v39 = vmax.f32 %v2237_v19, 0.0 }
 0x2f8   :  { %v2430_v36 = vmax.f32 %v2232_v35, 0.0 }
 0x2fa   :  { %v3142_v48 = vpack.c.bf16 %v2431_v39, %v2430_v36 }
 0x2fc   :  { %v3036_v47 = vpop.f32.mrb[116].mxu1  ;;  %3143 = vmatprep.subr.bf16.mxu1 %v3142_v48 }
 0x2fd   :  { %v2247_v49 = vadd.f32 %v3036_v47, %v3869_v31  ;;  %v2241_v54 = vpop.f32.mrb[117].mxu1  ;;  %3145 = vmatpush3.bf16.msra.mxu1 %v3911_v59 }
 0x2fe   :  { %v2242_v61 = vadd.f32 %v3869_v31, %v2241_v54 }
 0x2ff   :  { %v2433_v4 = vmax.f32 %v2247_v49, 0.0 }
 0x300   :  { %v2432_v2 = vmax.f32 %v2242_v61, 0.0  ;;  %2551 = vmatmul.mubr.f32.vlgmr.msra.gmra.mrb[148].mxu1 %v2469_v52 }
 0x301   :  { %2620 = vmatprep.mubr.f32.mxu1 %v2481_v33 }
 0x302   :  { %v3148_v58 = vpack.c.bf16 %v2433_v4, %v2432_v2 }
 0x304   :  { %v3039_v10 = vpop.f32.mrb[118].mxu1 }
 0x305   :  { %v2257_v63 = vadd.f32 %v3039_v10, %v3869_v31  ;;  %v2251_v60 = vpop.f32.mrb[119].mxu1 }
 0x306   :  { %v2252_v3 = vadd.f32 %v3869_v31, %v2251_v60 }
 0x307   :  { %v2435_v11 = vmax.f32 %v2257_v63, 0.0 }
 0x308   :  { %v2434_v59 = vmax.f32 %v2252_v3, 0.0 }
 0x30a   :  { %v3152_v62 = vpack.c.bf16 %v2435_v11, %v2434_v59 }
 0x30c   :  { %v3042_v0 = vpop.f32.mrb[120].mxu1 }
 0x30d   :  { %v2267_v6 = vadd.f32 %v3042_v0, %v3869_v31  ;;  %v2261_v17 = vpop.f32.mrb[121].mxu1 }
 0x30e   :  { %v2262_v55 = vadd.f32 %v3869_v31, %v2261_v17 }
 0x30f   :  { %v2437_v8 = vmax.f32 %v2267_v6, 0.0 }
 0x310   :  { %v2436_v18 = vmax.f32 %v2262_v55, 0.0 }
 0x312   :  { %v3960_v1 = vpack.c.bf16 %v2437_v8, %v2436_v18 }
 0x314   :  { %v3045_v9 = vpop.f32.mrb[122].mxu1 }
 0x315   :  { %v2277_v24 = vadd.f32 %v3045_v9, %v3869_v31  ;;  %v2271_v12 = vpop.f32.mrb[123].mxu1 }
 0x316   :  { %v2272_v23 = vadd.f32 %v3869_v31, %v2271_v12 }
 0x317   :  { %v2439_v5 = vmax.f32 %v2277_v24, 0.0 }
 0x318   :  { %v2438_v13 = vmax.f32 %v2272_v23, 0.0 }
 0x31a   :  { %v3964_v27 = vpack.c.bf16 %v2439_v5, %v2438_v13 }
 0x31c   :  { %v3048_v20 = vpop.f32.mrb[124].mxu1 }
 0x31d   :  { %v2287_v15 = vadd.f32 %v3048_v20, %v3869_v31  ;;  %v2281_v45 = vpop.f32.mrb[125].mxu1 }
 0x31e   :  { %v2282_v7 = vadd.f32 %v3869_v31, %v2281_v45 }
 0x31f   :  { %v2441_v37 = vmax.f32 %v2287_v15, 0.0 }
 0x320   :  { %v2440_v25 = vmax.f32 %v2282_v7, 0.0 }
 0x322   :  { %v3968_v57 = vpack.c.bf16 %v2441_v37, %v2440_v25 }
 0x324   :  { %v3051_v38 = vpop.f32.mrb[126].mxu1 }
 0x325   :  { %v2297_v14 = vadd.f32 %v3051_v38, %v3869_v31  ;;  %v2291_v41 = vpop.f32.mrb[127].mxu1 }
 0x326   :  { %v2292_v22 = vadd.f32 %v3869_v31, %v2291_v41 }
 0x327   :  { %v2443_v40 = vmax.f32 %v2297_v14, 0.0 }
 0x328   :  { %v2442_v43 = vmax.f32 %v2292_v22, 0.0 }
 0x32a   :  { %v3972_v16 = vpack.c.bf16 %v2443_v40, %v2442_v43 }
 0x32c   :  { %v3054_v32 = vpop.f32.mrb[128].mxu1 }
 0x32d   :  { %v2307_v29 = vadd.f32 %v3054_v32, %v3869_v31  ;;  %v2301_v21 = vpop.f32.mrb[129].mxu1 }
 0x32e   :  { %v2302_v44 = vadd.f32 %v3869_v31, %v2301_v21 }
 0x32f   :  { %v2445_v42 = vmax.f32 %v2307_v29, 0.0 }
 0x330   :  { %v2444_v30 = vmax.f32 %v2302_v44, 0.0 }
 0x332   :  { %v3976_v26 = vpack.c.bf16 %v2445_v42, %v2444_v30 }
 0x334   :  { %v3057_v46 = vpop.f32.mrb[130].mxu1 }
 0x335   :  { %v2317_v34 = vadd.f32 %v3057_v46, %v3869_v31  ;;  %v2311_v19 = vpop.f32.mrb[131].mxu1 }
 0x336   :  { %v2312_v53 = vadd.f32 %v3869_v31, %v2311_v19 }
 0x337   :  { %v2447_v35 = vmax.f32 %v2317_v34, 0.0 }
 0x338   :  { %v2446_v39 = vmax.f32 %v2312_v53, 0.0 }
 0x33a   :  { %v3980_v36 = vpack.c.bf16 %v2447_v35, %v2446_v39 }
 0x33c   :  { %v3060_v50 = vpop.f32.mrb[132].mxu1 }
 0x33d   :  { %v2327_v48 = vadd.f32 %v3060_v50, %v3869_v31  ;;  %v2321_v28 = vpop.f32.mrb[133].mxu1 }
 0x33e   :  { %v2322_v47 = vadd.f32 %v3869_v31, %v2321_v28 }
 0x33f   :  { %v2449_v52 = vmax.f32 %v2327_v48, 0.0 }
 0x340   :  { %v2448_v51 = vmax.f32 %v2322_v47, 0.0 }
 0x342   :  { %v3146_v49 = vpack.c.bf16 %v2449_v52, %v2448_v51 }
 0x344   :  { %v3063_v54 = vpop.f32.mrb[134].mxu1  ;;  %3147 = vmatprep.subr.bf16.mxu1 %v3146_v49 }
 0x345   :  { %v2337_v33 = vadd.f32 %v3063_v54, %v3869_v31  ;;  %v2331_v61 = vpop.f32.mrb[135].mxu1  ;;  %3149 = vmatpush3.bf16.msra.mxu1 %v3148_v58 }
 0x346   :  { %v2332_v4 = vadd.f32 %v3869_v31, %v2331_v61 }
 0x347   :  { %v2451_v2 = vmax.f32 %v2337_v33, 0.0 }
 0x348   :  { %v2450_v10 = vmax.f32 %v2332_v4, 0.0 }
 0x34a   :  { %v3150_v63 = vpack.c.bf16 %v2451_v2, %v2450_v10 }
 0x34c   :  { %v3066_v60 = vpop.f32.mrb[136].mxu1  ;;  %3151 = vmatprep.subr.bf16.mxu1 %v3150_v63 }
 0x34d   :  { %v2347_v3 = vadd.f32 %v3066_v60, %v3869_v31  ;;  %v2341_v11 = vpop.f32.mrb[137].mxu1  ;;  %3153 = vmatpush3.bf16.msra.mxu1 %v3152_v62 }
 0x34e   :  { %v2342_v59 = vadd.f32 %v3869_v31, %v2341_v11 }
 0x34f   :  { %v2453_v0 = vmax.f32 %v2347_v3, 0.0 }
 0x350   :  { %v2452_v6 = vmax.f32 %v2342_v59, 0.0 }
 0x352   :  { %v3154_v17 = vpack.c.bf16 %v2453_v0, %v2452_v6 }
 0x354   :  { %v3069_v55 = vpop.f32.mrb[138].mxu1  ;;  %3155 = vmatprep.subr.bf16.mxu1 %v3154_v17 }
 0x355   :  { %v2357_v58 = vadd.f32 %v3069_v55, %v3869_v31  ;;  %v2351_v8 = vpop.f32.mrb[139].mxu1  ;;  %3157 = vmatpush3.bf16.msra.mxu1 %v3960_v1 }
 0x356   :  { %v2352_v18 = vadd.f32 %v3869_v31, %v2351_v8 }
 0x357   :  { %v2455_v9 = vmax.f32 %v2357_v58, 0.0 }
 0x358   :  { %v2454_v24 = vmax.f32 %v2352_v18, 0.0 }
 0x35a   :  { %v3158_v12 = vpack.c.bf16 %v2455_v9, %v2454_v24 }
 0x35c   :  { %v3072_v23 = vpop.f32.mrb[140].mxu1  ;;  %3159 = vmatprep.subr.bf16.mxu1 %v3158_v12 }
 0x35d   :  { %v2367_v62 = vadd.f32 %v3072_v23, %v3869_v31  ;;  %v2361_v5 = vpop.f32.mrb[141].mxu1  ;;  %3161 = vmatpush3.bf16.msra.mxu1 %v3964_v27 }
 0x35e   :  { %v2362_v13 = vadd.f32 %v3869_v31, %v2361_v5 }
 0x35f   :  { %v2457_v20 = vmax.f32 %v2367_v62, 0.0 }
 0x360   :  { %v2456_v15 = vmax.f32 %v2362_v13, 0.0 }
 0x362   :  { %v3162_v45 = vpack.c.bf16 %v2457_v20, %v2456_v15 }
 0x364   :  { %v3075_v7 = vpop.f32.mrb[142].mxu1  ;;  %3163 = vmatprep.subr.bf16.mxu1 %v3162_v45 }
 0x365   :  { %v2377_v1 = vadd.f32 %v3075_v7, %v3869_v31  ;;  %v2371_v37 = vpop.f32.mrb[143].mxu1  ;;  %3165 = vmatpush3.bf16.msra.mxu1 %v3968_v57 }
 0x366   :  { %v2372_v25 = vadd.f32 %v3869_v31, %v2371_v37 }
 0x367   :  { %v2459_v38 = vmax.f32 %v2377_v1, 0.0 }
 0x368   :  { %v2458_v14 = vmax.f32 %v2372_v25, 0.0 }
 0x36a   :  { %v3166_v41 = vpack.c.bf16 %v2459_v38, %v2458_v14 }
 0x36c   :  { %v3078_v22 = vpop.f32.mrb[144].mxu1  ;;  %3167 = vmatprep.subr.bf16.mxu1 %v3166_v41 }
 0x36d   :  { %v2387_v27 = vadd.f32 %v3078_v22, %v3869_v31  ;;  %v2381_v40 = vpop.f32.mrb[145].mxu1  ;;  %3169 = vmatpush3.bf16.msra.mxu1 %v3972_v16 }
 0x36e   :  { %v2382_v43 = vadd.f32 %v3869_v31, %v2381_v40 }
 0x36f   :  { %v2461_v32 = vmax.f32 %v2387_v27, 0.0 }
 0x370   :  { %v2460_v29 = vmax.f32 %v2382_v43, 0.0 }
 0x372   :  { %v3170_v21 = vpack.c.bf16 %v2461_v32, %v2460_v29 }
 0x374   :  { %v3081_v44 = vpop.f32.mrb[146].mxu1  ;;  %3171 = vmatprep.subr.bf16.mxu1 %v3170_v21 }
 0x375   :  { %v2397_v57 = vadd.f32 %v3081_v44, %v3869_v31  ;;  %v2391_v42 = vpop.f32.mrb[147].mxu1  ;;  %3173 = vmatpush3.bf16.msra.mxu1 %v3976_v26 }
 0x376   :  { %v2392_v30 = vadd.f32 %v3869_v31, %v2391_v42 }
 0x377   :  { %v2463_v46 = vmax.f32 %v2397_v57, 0.0 }
 0x378   :  { %v2462_v34 = vmax.f32 %v2392_v30, 0.0 }
 0x37a   :  { %v3174_v19 = vpack.c.bf16 %v2463_v46, %v2462_v34 }
 0x37c   :  { %3175 = vmatprep.subr.bf16.mxu1 %v3174_v19 }
 0x37d   :  { %3177 = vmatpush3.bf16.msra.mxu1 %v3980_v36 }
 0x380   :  { %2621 = vmatmul.mubr.f32.vlgmr.msra.gmra.mrb[150].mxu1 %v3954_v56 }
 0x3d3   :  { %v2916_v16 = vpop.f32.mrb[148].mxu1 }
 0x3d4   :  { %v2917_v53 = vpop.f32.mrb[149].mxu1 }
 0x3d5   :  { %v2918_v35 = vadd.f32 %v2917_v53, %v2916_v16 }
 0x453   :  { %v2951_v39 = vpop.f32.mrb[150].mxu1 }
 0x454   :  { %v2952_v50 = vpop.f32.mrb[151].mxu1 }
 0x455   :  { %v2953_v48 = vadd.f32 %v2952_v50, %v2951_v39 }
 0x457   :  { %v2623_v28 = vadd.f32 %v2953_v48, %v2918_v35 }
 0x459   :  { %2626 = vst [vmem:[#allocation9] sm:$0x1] %v2623_v28 }
 0x45a   :  { %3608 = shalt.err (!%p3605_p0)
}
 0x45b   :  { %s3609_s15 = scalar_lea.hbm %s4022_s5, 16 }
 0x45c   :  { %p3610_p1 = scmp.ne.s32.totalorder %s4022_s5, %s3609_s15  ;;  %p3613_p2 = scmp.lt.u32.totalorder %s3609_s15, %s4022_s5 }
 0x45e   :  { %p3615_p3 = pnand %p3613_p2, %p3610_p1 }
 0x460   :  { %3618 = shalt.err (!%p3615_p3)
}
 0x461   :  { %2636 = dma.vmem_to_hbm [thread:$0]  %s2634_s10, 16, %s4022_s5, [#allocation5]  }
 0x462   :  { %3623 = dma.done.wait [#allocation5], 16  }
 0x463   :  { %3624 = vsyncadd [#allocation5], 4294967280 }
 0x464   :  { %2640 = vsyncpa [#allocation4], 1 }
 0x465   :  { %2641 = vsyncpa [#allocation7], 1 }
 0x466   :  { %2642 = vsyncpa [#allocation5], 1 }

</bundles_post_ra>
